<compile_context>
chip_gen: v5e
topology: v5e:2x2
jax: 0.10.0
libtpu: 0.0.40
codegen_flags: <defaults>
</compile_context>

<pallas_src>
import math
import numpy as np
import jax
import jax.numpy as jnp
from jax.experimental import pallas as pl
from jax.experimental.pallas import tpu as pltpu

# ---------------- model hyper-params (small, consistent with the module) ---
B_SZ    = 2          # batch
L_SEQ   = 8          # sequence length
D_MODEL = 32         # hidden_dim
N_STATE = 16         # d_state
EXPAND  = 2
D_INNER = EXPAND * D_MODEL          # 64
D_CONV  = 4
DT_RANK = math.ceil(D_MODEL / 16)   # 2
LN_EPS  = 1e-6
BL      = B_SZ * L_SEQ              # 16 folded tokens


def _silu(x):
    return x * (1.0 / (1.0 + jnp.exp(-x)))


def _softplus(x):
    # torch.nn.functional.softplus with threshold=20
    return jnp.where(x > 20.0, x, jnp.log(1.0 + jnp.exp(x)))


# ----------------------------- Pallas kernel -------------------------------
def vss_kernel(x_ref, ln_w_ref, ln_b_ref, w_in_ref, conv_w_ref, conv_b_ref,
               w_eff_ref, b_dt_ref, a_log2_ref, d_par_ref, w_out_ref, o_ref):
    x_in = x_ref[...]                                   # (B*L, D) f32

    # ---- LayerNorm(eps=1e-6) over channels (per token) ----
    mu = jnp.mean(x_in, axis=-1, keepdims=True)
    var = jnp.mean((x_in - mu) ** 2, axis=-1, keepdims=True)
    xn = (x_in - mu) * jax.lax.rsqrt(var + LN_EPS)
    xn = xn * ln_w_ref[...] + ln_b_ref[...]             # (B*L, D)

    # ---- in_proj: (B*L, D) @ (D, 2*d_inner), bf16 MXU / f32 accumulate ----
    xz = jnp.dot(xn.astype(jnp.bfloat16), w_in_ref[...],
                 preferred_element_type=jnp.float32)    # (B*L, 2*d_inner)
    xc = xz[:, :D_INNER]                                # (B*L, d_inner)
    z = xz[:, D_INNER:]                                 # (B*L, d_inner)

    # ---- causal depthwise conv1d (kernel D_CONV) + SiLU -------------------
    # value-level: static shifted slices of a zero-padded copy; the mask keeps
    # each folded sequence causal (no leakage across the batch fold).
    row = jax.lax.broadcasted_iota(jnp.int32, (BL, 1), 0)
    row_l = jnp.where(row >= L_SEQ, row - L_SEQ, row)   # position within its seq
    padded = jnp.concatenate(
        [jnp.zeros((D_CONV - 1, D_INNER), jnp.float32), xc], axis=0)  # (BL+3, 64)
    acc = jnp.broadcast_to(conv_b_ref[...], (BL, D_INNER)).astype(jnp.float32)
    for s in range(D_CONV):                             # static unroll; s = shift
        shifted = padded[D_CONV - 1 - s: D_CONV - 1 - s + BL, :]
        if s > 0:
            shifted = jnp.where(row_l >= s, shifted, 0.0)
        acc = acc + conv_w_ref[D_CONV - 1 - s: D_CONV - s, :] * shifted
    u = _silu(acc)                                      # (B*L, d_inner) f32

    # ---- fused x_proj + dt_proj: one (B*L,64)@(64,96) matmul --------------
    x_dbl = jnp.dot(u.astype(jnp.bfloat16), w_eff_ref[...],
                    preferred_element_type=jnp.float32)  # (B*L, 64+16+16)
    dt = _softplus(x_dbl[:, :D_INNER] + b_dt_ref[...])   # (B*L, d_inner)
    B_mat = x_dbl[:, D_INNER:D_INNER + N_STATE]          # (B*L, N)
    C_mat = x_dbl[:, D_INNER + N_STATE:]                 # (B*L, N)

    # ---- lane-fold the batch: (B*L, d_inner) -> (L, B*d_inner) ------------
    dt_f = jnp.concatenate(
        [dt[b * L_SEQ:(b + 1) * L_SEQ, :] for b in range(B_SZ)], axis=1)
    u_f = jnp.concatenate(
        [u[b * L_SEQ:(b + 1) * L_SEQ, :] for b in range(B_SZ)], axis=1)
    dtu_f = dt_f * u_f                                   # (L, B*d_inner)

    A2 = -jnp.exp(a_log2_ref[...])                       # (N, B*d_inner)
    B_T = B_mat.T                                        # (N, B*L)
    C_T = C_mat.T                                        # (N, B*L)

    # ---- selective scan: fully unrolled, lane-dense (16,128) state --------
    h = jnp.zeros((N_STATE, B_SZ * D_INNER), jnp.float32)
    ys = []
    for l in range(L_SEQ):                               # static unroll
        dA = jnp.exp(dt_f[l:l + 1, :] * A2)              # (N, B*d_inner)
        Bl = jnp.concatenate(
            [jnp.broadcast_to(B_T[:, b * L_SEQ + l: b * L_SEQ + l + 1],
                              (N_STATE, D_INNER)) for b in range(B_SZ)], axis=1)
        Cl = jnp.concatenate(
            [jnp.broadcast_to(C_T[:, b * L_SEQ + l: b * L_SEQ + l + 1],
                              (N_STATE, D_INNER)) for b in range(B_SZ)], axis=1)
        h = dA * h + dtu_f[l:l + 1, :] * Bl              # (N, B*d_inner)
        ys.append(jnp.sum(h * Cl, axis=0, keepdims=True))  # sublane reduce
    y_f = jnp.concatenate(ys, axis=0)                    # (L, B*d_inner)

    # ---- unfold lanes back, skip connection D, gate, out_proj, residual ---
    y = jnp.concatenate(
        [y_f[:, b * D_INNER:(b + 1) * D_INNER] for b in range(B_SZ)], axis=0)
    y = y + u * d_par_ref[...]                           # (B*L, d_inner)
    y = y * _silu(z)
    out = jnp.dot(y.astype(jnp.bfloat16), w_out_ref[...],
                  preferred_element_type=jnp.float32)    # (B*L, D)
    o_ref[...] = x_in + out                              # residual (drop_path = 0)


# ----------------------------- wrapper --------------------------------------
def vss_block(x, p):
    B, L, D = x.shape
    x2 = x.reshape(B * L, D)

    # weight prep (pure layout / algebraic fusion; forward semantics unchanged)
    w_in_b = p["w_in"].astype(jnp.bfloat16)                         # (D, 2*d_inner)
    w_eff = jnp.concatenate(
        [p["w_x"][:, :DT_RANK] @ p["w_dt"],                         # dt_proj fused
         p["w_x"][:, DT_RANK:]], axis=1).astype(jnp.bfloat16)       # (d_inner, 96)
    w_out_b = p["w_out"].astype(jnp.bfloat16)                       # (d_inner, D)
    a_log_t = p["A_log"].T                                          # (N, d_inner)
    a_log2 = jnp.concatenate([a_log_t] * B_SZ, axis=1)              # (N, B*d_inner)

    vmem = lambda: pl.BlockSpec(memory_space=pltpu.MemorySpace.VMEM)
    out = pl.pallas_call(
        vss_kernel,
        out_shape=jax.ShapeDtypeStruct((B * L, D), jnp.float32),
        in_specs=[vmem() for _ in range(11)],
        out_specs=vmem(),
    )(x2,
      p["ln_w"].reshape(1, D), p["ln_b"].reshape(1, D),
      w_in_b, p["conv_w"], p["conv_b"].reshape(1, D_INNER),
      w_eff, p["b_dt"].reshape(1, D_INNER),
      a_log2, p["D"].reshape(1, D_INNER), w_out_b)
    return out.reshape(B, L, D)


# ----------------------------- pure-JAX reference ---------------------------
def vss_reference(x, p):
    mu = x.mean(-1, keepdims=True)
    var = ((x - mu) ** 2).mean(-1, keepdims=True)
    xn = (x - mu) / jnp.sqrt(var + LN_EPS) * p["ln_w"] + p["ln_b"]
    xz = xn @ p["w_in"]
    xc, z = xz[..., :D_INNER], xz[..., D_INNER:]
    xp = jnp.pad(xc, ((0, 0), (D_CONV - 1, 0), (0, 0)))
    acc = jnp.broadcast_to(p["conv_b"], (x.shape[0], L_SEQ, D_INNER))
    for k in range(D_CONV):
        acc = acc + p["conv_w"][k] * xp[:, k:k + L_SEQ, :]
    u = _silu(acc)
    x_dbl = u @ p["w_x"]
    dt_in = x_dbl[..., :DT_RANK]
    Bm = x_dbl[..., DT_RANK:DT_RANK + N_STATE]
    Cm = x_dbl[..., DT_RANK + N_STATE:]
    dt = _softplus(dt_in @ p["w_dt"] + p["b_dt"])
    A = -jnp.exp(p["A_log"])

    def scan_fn(h, inp):
        dt_l, u_l, B_l, C_l = inp
        dA = jnp.exp(dt_l[..., None] * A)
        h = dA * h + (dt_l * u_l)[..., None] * B_l[:, None, :]
        y = jnp.sum(h * C_l[:, None, :], axis=-1)
        return h, y

    h0 = jnp.zeros((x.shape[0], D_INNER, N_STATE), jnp.float32)
    _, ys = jax.lax.scan(
        scan_fn, h0,
        (dt.transpose(1, 0, 2), u.transpose(1, 0, 2),
         Bm.transpose(1, 0, 2), Cm.transpose(1, 0, 2)))
    y = ys.transpose(1, 0, 2) + u * p["D"]
    y = y * _silu(z)
    out = y @ p["w_out"]
    return x + out


# ----------------------------- main -----------------------------------------
if __name__ == "__main__":
    key = jax.random.PRNGKey(0)
    ks = jax.random.split(key, 10)

    def nrm(k, shape, scale=0.02):
        return (scale * jax.random.normal(k, shape)).astype(jnp.float32)

    params = {
        "ln_w": jnp.ones((D_MODEL,), jnp.float32),
        "ln_b": jnp.zeros((D_MODEL,), jnp.float32),
        "w_in": nrm(ks[0], (D_MODEL, 2 * D_INNER)),
        "conv_w": nrm(ks[1], (D_CONV, D_INNER), 0.1),
        "conv_b": nrm(ks[2], (D_INNER,), 0.1),
        "w_x": nrm(ks[3], (D_INNER, DT_RANK + 2 * N_STATE)),
        "w_dt": nrm(ks[4], (DT_RANK, D_INNER), 0.5),
        "b_dt": nrm(ks[5], (D_INNER,), 0.5),
        "A_log": jnp.log(jnp.tile(
            jnp.arange(1, N_STATE + 1, dtype=jnp.float32)[None, :],
            (D_INNER, 1))),
        "D": jnp.ones((D_INNER,), jnp.float32),
        "w_out": nrm(ks[6], (D_INNER, D_MODEL)),
    }
    x = jax.random.normal(ks[7], (B_SZ, L_SEQ, D_MODEL), jnp.float32)

    out = vss_block(x, params)
    out = jax.block_until_ready(out)

    ref = jax.block_until_ready(vss_reference(x, params))
    np.testing.assert_allclose(np.asarray(out), np.asarray(ref),
                               rtol=2e-3, atol=2e-3)
    print("KERNEL_OK")
</pallas_src>

<mosaic_0001>
module attributes {stable_mosaic.version = 11 : i64} {
  func.func @vss_kernel(%arg0: memref<16x32xf32, #tpu.memory_space<vmem>>, %arg1: memref<1x32xf32, #tpu.memory_space<vmem>>, %arg2: memref<1x32xf32, #tpu.memory_space<vmem>>, %arg3: memref<32x128xbf16, #tpu.memory_space<vmem>>, %arg4: memref<4x64xf32, #tpu.memory_space<vmem>>, %arg5: memref<1x64xf32, #tpu.memory_space<vmem>>, %arg6: memref<64x96xbf16, #tpu.memory_space<vmem>>, %arg7: memref<1x64xf32, #tpu.memory_space<vmem>>, %arg8: memref<16x128xf32, #tpu.memory_space<vmem>>, %arg9: memref<1x64xf32, #tpu.memory_space<vmem>>, %arg10: memref<64x32xbf16, #tpu.memory_space<vmem>>, %arg11: memref<16x32xf32, #tpu.memory_space<vmem>>) attributes {dimension_semantics = [], scalar_prefetch = 0 : i64, scratch_operands = 0 : i64, tpu.core_type = #tpu.core_type<tc>} {
    %c0 = arith.constant 0 : index
    %c0_0 = arith.constant 0 : index
    %0 = vector.load %arg0[%c0, %c0_0] : memref<16x32xf32, #tpu.memory_space<vmem>>, vector<16x32xf32>
    %cst = arith.constant dense<0.000000e+00> : vector<16xf32>
    %1 = vector.multi_reduction <add>, %0, %cst [1] : vector<16x32xf32> to vector<16xf32>
    %2 = vector.shape_cast %1 : vector<16xf32> to vector<16x1xf32>
    %cst_1 = arith.constant 3.200000e+01 : f32
    %3 = vector.broadcast %cst_1 : f32 to vector<16x1xf32>
    %4 = arith.divf %2, %3 : vector<16x1xf32>
    %5 = vector.broadcast %4 : vector<16x1xf32> to vector<16x32xf32>
    %6 = arith.subf %0, %5 : vector<16x32xf32>
    %7 = arith.mulf %6, %6 : vector<16x32xf32>
    %cst_2 = arith.constant dense<0.000000e+00> : vector<16xf32>
    %8 = vector.multi_reduction <add>, %7, %cst_2 [1] : vector<16x32xf32> to vector<16xf32>
    %9 = vector.shape_cast %8 : vector<16xf32> to vector<16x1xf32>
    %cst_3 = arith.constant 3.200000e+01 : f32
    %10 = vector.broadcast %cst_3 : f32 to vector<16x1xf32>
    %11 = arith.divf %9, %10 : vector<16x1xf32>
    %12 = vector.broadcast %4 : vector<16x1xf32> to vector<16x32xf32>
    %13 = arith.subf %0, %12 : vector<16x32xf32>
    %cst_4 = arith.constant 9.99999997E-7 : f32
    %14 = vector.broadcast %cst_4 : f32 to vector<16x1xf32>
    %15 = arith.addf %11, %14 : vector<16x1xf32>
    %16 = math.rsqrt %15 : vector<16x1xf32>
    %17 = vector.broadcast %16 : vector<16x1xf32> to vector<16x32xf32>
    %18 = arith.mulf %13, %17 : vector<16x32xf32>
    %c0_5 = arith.constant 0 : index
    %c0_6 = arith.constant 0 : index
    %19 = vector.load %arg1[%c0_5, %c0_6] : memref<1x32xf32, #tpu.memory_space<vmem>>, vector<1x32xf32>
    %20 = vector.broadcast %19 : vector<1x32xf32> to vector<16x32xf32>
    %21 = arith.mulf %18, %20 : vector<16x32xf32>
    %c0_7 = arith.constant 0 : index
    %c0_8 = arith.constant 0 : index
    %22 = vector.load %arg2[%c0_7, %c0_8] : memref<1x32xf32, #tpu.memory_space<vmem>>, vector<1x32xf32>
    %23 = vector.broadcast %22 : vector<1x32xf32> to vector<16x32xf32>
    %24 = arith.addf %21, %23 : vector<16x32xf32>
    %25 = arith.truncf %24 : vector<16x32xf32> to vector<16x32xbf16>
    %c0_9 = arith.constant 0 : index
    %c0_10 = arith.constant 0 : index
    %26 = vector.load %arg3[%c0_9, %c0_10] : memref<32x128xbf16, #tpu.memory_space<vmem>>, vector<32x128xbf16>
    %cst_11 = arith.constant dense<0.000000e+00> : vector<16x128xf32>
    %27 = tpu.matmul %25, %26, %cst_11 {dimension_numbers = #tpu.dot_dimension_numbers<[1], [0], [0], [1], [0, 0, 1, 1], [], []>} : vector<16x32xbf16>, vector<32x128xbf16>, vector<16x128xf32> -> vector<16x128xf32>
    %28 = vector.extract_strided_slice %27 {offsets = [0, 0], sizes = [16, 64], strides = [1, 1]} : vector<16x128xf32> to vector<16x64xf32>
    %29 = vector.extract_strided_slice %27 {offsets = [0, 64], sizes = [16, 64], strides = [1, 1]} : vector<16x128xf32> to vector<16x64xf32>
    %30 = tpu.iota {dimensions = array<i32: 0>} : vector<16x1xi32>
    %c8_i32 = arith.constant 8 : i32
    %31 = vector.broadcast %c8_i32 : i32 to vector<16x1xi32>
    %32 = arith.cmpi sge, %30, %31 : vector<16x1xi32>
    %c8_i32_12 = arith.constant 8 : i32
    %33 = vector.broadcast %c8_i32_12 : i32 to vector<16x1xi32>
    %34 = arith.subi %30, %33 : vector<16x1xi32>
    %35 = arith.select %32, %34, %30 : vector<16x1xi1>, vector<16x1xi32>
    %cst_13 = arith.constant 0.000000e+00 : f32
    %36 = vector.broadcast %cst_13 : f32 to vector<3x64xf32>
    %37 = tpu.concatenate %36, %28 in 0 : vector<3x64xf32>, vector<16x64xf32> -> vector<19x64xf32>
    %c0_14 = arith.constant 0 : index
    %c0_15 = arith.constant 0 : index
    %38 = vector.load %arg5[%c0_14, %c0_15] : memref<1x64xf32, #tpu.memory_space<vmem>>, vector<1x64xf32>
    %39 = vector.shape_cast %38 : vector<1x64xf32> to vector<1x64xf32>
    %40 = vector.broadcast %39 : vector<1x64xf32> to vector<16x64xf32>
    %41 = vector.extract_strided_slice %37 {offsets = [3, 0], sizes = [16, 64], strides = [1, 1]} : vector<19x64xf32> to vector<16x64xf32>
    %c3 = arith.constant 3 : index
    %c0_16 = arith.constant 0 : index
    %42 = vector.load %arg4[%c3, %c0_16] : memref<4x64xf32, #tpu.memory_space<vmem>>, vector<1x64xf32>
    %43 = vector.broadcast %42 : vector<1x64xf32> to vector<16x64xf32>
    %44 = arith.mulf %43, %41 : vector<16x64xf32>
    %45 = arith.addf %40, %44 : vector<16x64xf32>
    %46 = vector.extract_strided_slice %37 {offsets = [2, 0], sizes = [16, 64], strides = [1, 1]} : vector<19x64xf32> to vector<16x64xf32>
    %c1_i32 = arith.constant 1 : i32
    %47 = vector.broadcast %c1_i32 : i32 to vector<16x1xi32>
    %48 = arith.cmpi sge, %35, %47 : vector<16x1xi32>
    %cst_17 = arith.constant 0.000000e+00 : f32
    %49 = vector.shape_cast %48 : vector<16x1xi1> to vector<16x1xi1>
    %50 = vector.broadcast %49 : vector<16x1xi1> to vector<16x64xi1>
    %51 = vector.broadcast %cst_17 : f32 to vector<16x64xf32>
    %52 = arith.select %50, %46, %51 : vector<16x64xi1>, vector<16x64xf32>
    %c2 = arith.constant 2 : index
    %c0_18 = arith.constant 0 : index
    %53 = vector.load %arg4[%c2, %c0_18] : memref<4x64xf32, #tpu.memory_space<vmem>>, vector<1x64xf32>
    %54 = vector.broadcast %53 : vector<1x64xf32> to vector<16x64xf32>
    %55 = arith.mulf %54, %52 : vector<16x64xf32>
    %56 = arith.addf %45, %55 : vector<16x64xf32>
    %57 = vector.extract_strided_slice %37 {offsets = [1, 0], sizes = [16, 64], strides = [1, 1]} : vector<19x64xf32> to vector<16x64xf32>
    %c2_i32 = arith.constant 2 : i32
    %58 = vector.broadcast %c2_i32 : i32 to vector<16x1xi32>
    %59 = arith.cmpi sge, %35, %58 : vector<16x1xi32>
    %cst_19 = arith.constant 0.000000e+00 : f32
    %60 = vector.shape_cast %59 : vector<16x1xi1> to vector<16x1xi1>
    %61 = vector.broadcast %60 : vector<16x1xi1> to vector<16x64xi1>
    %62 = vector.broadcast %cst_19 : f32 to vector<16x64xf32>
    %63 = arith.select %61, %57, %62 : vector<16x64xi1>, vector<16x64xf32>
    %c1 = arith.constant 1 : index
    %c0_20 = arith.constant 0 : index
    %64 = vector.load %arg4[%c1, %c0_20] : memref<4x64xf32, #tpu.memory_space<vmem>>, vector<1x64xf32>
    %65 = vector.broadcast %64 : vector<1x64xf32> to vector<16x64xf32>
    %66 = arith.mulf %65, %63 : vector<16x64xf32>
    %67 = arith.addf %56, %66 : vector<16x64xf32>
    %68 = vector.extract_strided_slice %37 {offsets = [0, 0], sizes = [16, 64], strides = [1, 1]} : vector<19x64xf32> to vector<16x64xf32>
    %c3_i32 = arith.constant 3 : i32
    %69 = vector.broadcast %c3_i32 : i32 to vector<16x1xi32>
    %70 = arith.cmpi sge, %35, %69 : vector<16x1xi32>
    %cst_21 = arith.constant 0.000000e+00 : f32
    %71 = vector.shape_cast %70 : vector<16x1xi1> to vector<16x1xi1>
    %72 = vector.broadcast %71 : vector<16x1xi1> to vector<16x64xi1>
    %73 = vector.broadcast %cst_21 : f32 to vector<16x64xf32>
    %74 = arith.select %72, %68, %73 : vector<16x64xi1>, vector<16x64xf32>
    %c0_22 = arith.constant 0 : index
    %c0_23 = arith.constant 0 : index
    %75 = vector.load %arg4[%c0_22, %c0_23] : memref<4x64xf32, #tpu.memory_space<vmem>>, vector<1x64xf32>
    %76 = vector.broadcast %75 : vector<1x64xf32> to vector<16x64xf32>
    %77 = arith.mulf %76, %74 : vector<16x64xf32>
    %78 = arith.addf %67, %77 : vector<16x64xf32>
    %cst_24 = arith.constant 0.000000e+00 : f32
    %79 = vector.broadcast %cst_24 : f32 to vector<16x64xf32>
    %80 = arith.subf %79, %78 : vector<16x64xf32>
    %81 = math.exp %80 : vector<16x64xf32>
    %cst_25 = arith.constant 1.000000e+00 : f32
    %82 = vector.broadcast %cst_25 : f32 to vector<16x64xf32>
    %83 = arith.addf %82, %81 : vector<16x64xf32>
    %cst_26 = arith.constant 1.000000e+00 : f32
    %84 = vector.broadcast %cst_26 : f32 to vector<16x64xf32>
    %85 = arith.divf %84, %83 : vector<16x64xf32>
    %86 = arith.mulf %78, %85 : vector<16x64xf32>
    %87 = arith.truncf %86 : vector<16x64xf32> to vector<16x64xbf16>
    %c0_27 = arith.constant 0 : index
    %c0_28 = arith.constant 0 : index
    %88 = vector.load %arg6[%c0_27, %c0_28] : memref<64x96xbf16, #tpu.memory_space<vmem>>, vector<64x96xbf16>
    %cst_29 = arith.constant dense<0.000000e+00> : vector<16x96xf32>
    %89 = tpu.matmul %87, %88, %cst_29 {dimension_numbers = #tpu.dot_dimension_numbers<[1], [0], [0], [1], [0, 0, 1, 1], [], []>} : vector<16x64xbf16>, vector<64x96xbf16>, vector<16x96xf32> -> vector<16x96xf32>
    %90 = vector.extract_strided_slice %89 {offsets = [0, 0], sizes = [16, 64], strides = [1, 1]} : vector<16x96xf32> to vector<16x64xf32>
    %c0_30 = arith.constant 0 : index
    %c0_31 = arith.constant 0 : index
    %91 = vector.load %arg7[%c0_30, %c0_31] : memref<1x64xf32, #tpu.memory_space<vmem>>, vector<1x64xf32>
    %92 = vector.broadcast %91 : vector<1x64xf32> to vector<16x64xf32>
    %93 = arith.addf %90, %92 : vector<16x64xf32>
    %cst_32 = arith.constant 2.000000e+01 : f32
    %94 = vector.broadcast %cst_32 : f32 to vector<16x64xf32>
    %95 = arith.cmpf ogt, %93, %94 : vector<16x64xf32>
    %96 = math.exp %93 : vector<16x64xf32>
    %cst_33 = arith.constant 1.000000e+00 : f32
    %97 = vector.broadcast %cst_33 : f32 to vector<16x64xf32>
    %98 = arith.addf %97, %96 : vector<16x64xf32>
    %99 = math.log %98 : vector<16x64xf32>
    %100 = arith.select %95, %93, %99 : vector<16x64xi1>, vector<16x64xf32>
    %101 = vector.extract_strided_slice %89 {offsets = [0, 64], sizes = [16, 16], strides = [1, 1]} : vector<16x96xf32> to vector<16x16xf32>
    %102 = vector.extract_strided_slice %89 {offsets = [0, 80], sizes = [16, 16], strides = [1, 1]} : vector<16x96xf32> to vector<16x16xf32>
    %103 = vector.extract_strided_slice %100 {offsets = [0, 0], sizes = [8, 64], strides = [1, 1]} : vector<16x64xf32> to vector<8x64xf32>
    %104 = vector.extract_strided_slice %100 {offsets = [8, 0], sizes = [8, 64], strides = [1, 1]} : vector<16x64xf32> to vector<8x64xf32>
    %105 = tpu.concatenate %103, %104 in 1 : vector<8x64xf32>, vector<8x64xf32> -> vector<8x128xf32>
    %106 = vector.extract_strided_slice %86 {offsets = [0, 0], sizes = [8, 64], strides = [1, 1]} : vector<16x64xf32> to vector<8x64xf32>
    %107 = vector.extract_strided_slice %86 {offsets = [8, 0], sizes = [8, 64], strides = [1, 1]} : vector<16x64xf32> to vector<8x64xf32>
    %108 = tpu.concatenate %106, %107 in 1 : vector<8x64xf32>, vector<8x64xf32> -> vector<8x128xf32>
    %109 = arith.mulf %105, %108 : vector<8x128xf32>
    %c0_34 = arith.constant 0 : index
    %c0_35 = arith.constant 0 : index
    %110 = vector.load %arg8[%c0_34, %c0_35] : memref<16x128xf32, #tpu.memory_space<vmem>>, vector<16x128xf32>
    %111 = math.exp %110 : vector<16x128xf32>
    %cst_36 = arith.constant 0.000000e+00 : f32
    %112 = vector.broadcast %cst_36 : f32 to vector<16x128xf32>
    %113 = arith.subf %112, %111 : vector<16x128xf32>
    %114 = tpu.transpose %101, [1, 0] : vector<16x16xf32> -> vector<16x16xf32>
    %115 = tpu.transpose %102, [1, 0] : vector<16x16xf32> -> vector<16x16xf32>
    %cst_37 = arith.constant 0.000000e+00 : f32
    %116 = vector.broadcast %cst_37 : f32 to vector<16x128xf32>
    %117 = vector.extract_strided_slice %105 {offsets = [0, 0], sizes = [1, 128], strides = [1, 1]} : vector<8x128xf32> to vector<1x128xf32>
    %118 = vector.broadcast %117 : vector<1x128xf32> to vector<16x128xf32>
    %119 = arith.mulf %118, %113 : vector<16x128xf32>
    %120 = math.exp %119 : vector<16x128xf32>
    %121 = vector.extract_strided_slice %114 {offsets = [0, 0], sizes = [16, 1], strides = [1, 1]} : vector<16x16xf32> to vector<16x1xf32>
    %122 = vector.shape_cast %121 : vector<16x1xf32> to vector<16x1xf32>
    %123 = vector.broadcast %122 : vector<16x1xf32> to vector<16x64xf32>
    %124 = vector.extract_strided_slice %114 {offsets = [0, 8], sizes = [16, 1], strides = [1, 1]} : vector<16x16xf32> to vector<16x1xf32>
    %125 = vector.shape_cast %124 : vector<16x1xf32> to vector<16x1xf32>
    %126 = vector.broadcast %125 : vector<16x1xf32> to vector<16x64xf32>
    %127 = tpu.concatenate %123, %126 in 1 : vector<16x64xf32>, vector<16x64xf32> -> vector<16x128xf32>
    %128 = vector.extract_strided_slice %115 {offsets = [0, 0], sizes = [16, 1], strides = [1, 1]} : vector<16x16xf32> to vector<16x1xf32>
    %129 = vector.shape_cast %128 : vector<16x1xf32> to vector<16x1xf32>
    %130 = vector.broadcast %129 : vector<16x1xf32> to vector<16x64xf32>
    %131 = vector.extract_strided_slice %115 {offsets = [0, 8], sizes = [16, 1], strides = [1, 1]} : vector<16x16xf32> to vector<16x1xf32>
    %132 = vector.shape_cast %131 : vector<16x1xf32> to vector<16x1xf32>
    %133 = vector.broadcast %132 : vector<16x1xf32> to vector<16x64xf32>
    %134 = tpu.concatenate %130, %133 in 1 : vector<16x64xf32>, vector<16x64xf32> -> vector<16x128xf32>
    %135 = arith.mulf %120, %116 : vector<16x128xf32>
    %136 = vector.extract_strided_slice %109 {offsets = [0, 0], sizes = [1, 128], strides = [1, 1]} : vector<8x128xf32> to vector<1x128xf32>
    %137 = vector.broadcast %136 : vector<1x128xf32> to vector<16x128xf32>
    %138 = arith.mulf %137, %127 : vector<16x128xf32>
    %139 = arith.addf %135, %138 : vector<16x128xf32>
    %140 = arith.mulf %139, %134 : vector<16x128xf32>
    %cst_38 = arith.constant dense<0.000000e+00> : vector<128xf32>
    %141 = vector.multi_reduction <add>, %140, %cst_38 [0] : vector<16x128xf32> to vector<128xf32>
    %142 = vector.shape_cast %141 : vector<128xf32> to vector<1x128xf32>
    %143 = vector.extract_strided_slice %105 {offsets = [1, 0], sizes = [1, 128], strides = [1, 1]} : vector<8x128xf32> to vector<1x128xf32>
    %144 = vector.broadcast %143 : vector<1x128xf32> to vector<16x128xf32>
    %145 = arith.mulf %144, %113 : vector<16x128xf32>
    %146 = math.exp %145 : vector<16x128xf32>
    %147 = vector.extract_strided_slice %114 {offsets = [0, 1], sizes = [16, 1], strides = [1, 1]} : vector<16x16xf32> to vector<16x1xf32>
    %148 = vector.shape_cast %147 : vector<16x1xf32> to vector<16x1xf32>
    %149 = vector.broadcast %148 : vector<16x1xf32> to vector<16x64xf32>
    %150 = vector.extract_strided_slice %114 {offsets = [0, 9], sizes = [16, 1], strides = [1, 1]} : vector<16x16xf32> to vector<16x1xf32>
    %151 = vector.shape_cast %150 : vector<16x1xf32> to vector<16x1xf32>
    %152 = vector.broadcast %151 : vector<16x1xf32> to vector<16x64xf32>
    %153 = tpu.concatenate %149, %152 in 1 : vector<16x64xf32>, vector<16x64xf32> -> vector<16x128xf32>
    %154 = vector.extract_strided_slice %115 {offsets = [0, 1], sizes = [16, 1], strides = [1, 1]} : vector<16x16xf32> to vector<16x1xf32>
    %155 = vector.shape_cast %154 : vector<16x1xf32> to vector<16x1xf32>
    %156 = vector.broadcast %155 : vector<16x1xf32> to vector<16x64xf32>
    %157 = vector.extract_strided_slice %115 {offsets = [0, 9], sizes = [16, 1], strides = [1, 1]} : vector<16x16xf32> to vector<16x1xf32>
    %158 = vector.shape_cast %157 : vector<16x1xf32> to vector<16x1xf32>
    %159 = vector.broadcast %158 : vector<16x1xf32> to vector<16x64xf32>
    %160 = tpu.concatenate %156, %159 in 1 : vector<16x64xf32>, vector<16x64xf32> -> vector<16x128xf32>
    %161 = arith.mulf %146, %139 : vector<16x128xf32>
    %162 = vector.extract_strided_slice %109 {offsets = [1, 0], sizes = [1, 128], strides = [1, 1]} : vector<8x128xf32> to vector<1x128xf32>
    %163 = vector.broadcast %162 : vector<1x128xf32> to vector<16x128xf32>
    %164 = arith.mulf %163, %153 : vector<16x128xf32>
    %165 = arith.addf %161, %164 : vector<16x128xf32>
    %166 = arith.mulf %165, %160 : vector<16x128xf32>
    %cst_39 = arith.constant dense<0.000000e+00> : vector<128xf32>
    %167 = vector.multi_reduction <add>, %166, %cst_39 [0] : vector<16x128xf32> to vector<128xf32>
    %168 = vector.shape_cast %167 : vector<128xf32> to vector<1x128xf32>
    %169 = vector.extract_strided_slice %105 {offsets = [2, 0], sizes = [1, 128], strides = [1, 1]} : vector<8x128xf32> to vector<1x128xf32>
    %170 = vector.broadcast %169 : vector<1x128xf32> to vector<16x128xf32>
    %171 = arith.mulf %170, %113 : vector<16x128xf32>
    %172 = math.exp %171 : vector<16x128xf32>
    %173 = vector.extract_strided_slice %114 {offsets = [0, 2], sizes = [16, 1], strides = [1, 1]} : vector<16x16xf32> to vector<16x1xf32>
    %174 = vector.shape_cast %173 : vector<16x1xf32> to vector<16x1xf32>
    %175 = vector.broadcast %174 : vector<16x1xf32> to vector<16x64xf32>
    %176 = vector.extract_strided_slice %114 {offsets = [0, 10], sizes = [16, 1], strides = [1, 1]} : vector<16x16xf32> to vector<16x1xf32>
    %177 = vector.shape_cast %176 : vector<16x1xf32> to vector<16x1xf32>
    %178 = vector.broadcast %177 : vector<16x1xf32> to vector<16x64xf32>
    %179 = tpu.concatenate %175, %178 in 1 : vector<16x64xf32>, vector<16x64xf32> -> vector<16x128xf32>
    %180 = vector.extract_strided_slice %115 {offsets = [0, 2], sizes = [16, 1], strides = [1, 1]} : vector<16x16xf32> to vector<16x1xf32>
    %181 = vector.shape_cast %180 : vector<16x1xf32> to vector<16x1xf32>
    %182 = vector.broadcast %181 : vector<16x1xf32> to vector<16x64xf32>
    %183 = vector.extract_strided_slice %115 {offsets = [0, 10], sizes = [16, 1], strides = [1, 1]} : vector<16x16xf32> to vector<16x1xf32>
    %184 = vector.shape_cast %183 : vector<16x1xf32> to vector<16x1xf32>
    %185 = vector.broadcast %184 : vector<16x1xf32> to vector<16x64xf32>
    %186 = tpu.concatenate %182, %185 in 1 : vector<16x64xf32>, vector<16x64xf32> -> vector<16x128xf32>
    %187 = arith.mulf %172, %165 : vector<16x128xf32>
    %188 = vector.extract_strided_slice %109 {offsets = [2, 0], sizes = [1, 128], strides = [1, 1]} : vector<8x128xf32> to vector<1x128xf32>
    %189 = vector.broadcast %188 : vector<1x128xf32> to vector<16x128xf32>
    %190 = arith.mulf %189, %179 : vector<16x128xf32>
    %191 = arith.addf %187, %190 : vector<16x128xf32>
    %192 = arith.mulf %191, %186 : vector<16x128xf32>
    %cst_40 = arith.constant dense<0.000000e+00> : vector<128xf32>
    %193 = vector.multi_reduction <add>, %192, %cst_40 [0] : vector<16x128xf32> to vector<128xf32>
    %194 = vector.shape_cast %193 : vector<128xf32> to vector<1x128xf32>
    %195 = vector.extract_strided_slice %105 {offsets = [3, 0], sizes = [1, 128], strides = [1, 1]} : vector<8x128xf32> to vector<1x128xf32>
    %196 = vector.broadcast %195 : vector<1x128xf32> to vector<16x128xf32>
    %197 = arith.mulf %196, %113 : vector<16x128xf32>
    %198 = math.exp %197 : vector<16x128xf32>
    %199 = vector.extract_strided_slice %114 {offsets = [0, 3], sizes = [16, 1], strides = [1, 1]} : vector<16x16xf32> to vector<16x1xf32>
    %200 = vector.shape_cast %199 : vector<16x1xf32> to vector<16x1xf32>
    %201 = vector.broadcast %200 : vector<16x1xf32> to vector<16x64xf32>
    %202 = vector.extract_strided_slice %114 {offsets = [0, 11], sizes = [16, 1], strides = [1, 1]} : vector<16x16xf32> to vector<16x1xf32>
    %203 = vector.shape_cast %202 : vector<16x1xf32> to vector<16x1xf32>
    %204 = vector.broadcast %203 : vector<16x1xf32> to vector<16x64xf32>
    %205 = tpu.concatenate %201, %204 in 1 : vector<16x64xf32>, vector<16x64xf32> -> vector<16x128xf32>
    %206 = vector.extract_strided_slice %115 {offsets = [0, 3], sizes = [16, 1], strides = [1, 1]} : vector<16x16xf32> to vector<16x1xf32>
    %207 = vector.shape_cast %206 : vector<16x1xf32> to vector<16x1xf32>
    %208 = vector.broadcast %207 : vector<16x1xf32> to vector<16x64xf32>
    %209 = vector.extract_strided_slice %115 {offsets = [0, 11], sizes = [16, 1], strides = [1, 1]} : vector<16x16xf32> to vector<16x1xf32>
    %210 = vector.shape_cast %209 : vector<16x1xf32> to vector<16x1xf32>
    %211 = vector.broadcast %210 : vector<16x1xf32> to vector<16x64xf32>
    %212 = tpu.concatenate %208, %211 in 1 : vector<16x64xf32>, vector<16x64xf32> -> vector<16x128xf32>
    %213 = arith.mulf %198, %191 : vector<16x128xf32>
    %214 = vector.extract_strided_slice %109 {offsets = [3, 0], sizes = [1, 128], strides = [1, 1]} : vector<8x128xf32> to vector<1x128xf32>
    %215 = vector.broadcast %214 : vector<1x128xf32> to vector<16x128xf32>
    %216 = arith.mulf %215, %205 : vector<16x128xf32>
    %217 = arith.addf %213, %216 : vector<16x128xf32>
    %218 = arith.mulf %217, %212 : vector<16x128xf32>
    %cst_41 = arith.constant dense<0.000000e+00> : vector<128xf32>
    %219 = vector.multi_reduction <add>, %218, %cst_41 [0] : vector<16x128xf32> to vector<128xf32>
    %220 = vector.shape_cast %219 : vector<128xf32> to vector<1x128xf32>
    %221 = vector.extract_strided_slice %105 {offsets = [4, 0], sizes = [1, 128], strides = [1, 1]} : vector<8x128xf32> to vector<1x128xf32>
    %222 = vector.broadcast %221 : vector<1x128xf32> to vector<16x128xf32>
    %223 = arith.mulf %222, %113 : vector<16x128xf32>
    %224 = math.exp %223 : vector<16x128xf32>
    %225 = vector.extract_strided_slice %114 {offsets = [0, 4], sizes = [16, 1], strides = [1, 1]} : vector<16x16xf32> to vector<16x1xf32>
    %226 = vector.shape_cast %225 : vector<16x1xf32> to vector<16x1xf32>
    %227 = vector.broadcast %226 : vector<16x1xf32> to vector<16x64xf32>
    %228 = vector.extract_strided_slice %114 {offsets = [0, 12], sizes = [16, 1], strides = [1, 1]} : vector<16x16xf32> to vector<16x1xf32>
    %229 = vector.shape_cast %228 : vector<16x1xf32> to vector<16x1xf32>
    %230 = vector.broadcast %229 : vector<16x1xf32> to vector<16x64xf32>
    %231 = tpu.concatenate %227, %230 in 1 : vector<16x64xf32>, vector<16x64xf32> -> vector<16x128xf32>
    %232 = vector.extract_strided_slice %115 {offsets = [0, 4], sizes = [16, 1], strides = [1, 1]} : vector<16x16xf32> to vector<16x1xf32>
    %233 = vector.shape_cast %232 : vector<16x1xf32> to vector<16x1xf32>
    %234 = vector.broadcast %233 : vector<16x1xf32> to vector<16x64xf32>
    %235 = vector.extract_strided_slice %115 {offsets = [0, 12], sizes = [16, 1], strides = [1, 1]} : vector<16x16xf32> to vector<16x1xf32>
    %236 = vector.shape_cast %235 : vector<16x1xf32> to vector<16x1xf32>
    %237 = vector.broadcast %236 : vector<16x1xf32> to vector<16x64xf32>
    %238 = tpu.concatenate %234, %237 in 1 : vector<16x64xf32>, vector<16x64xf32> -> vector<16x128xf32>
    %239 = arith.mulf %224, %217 : vector<16x128xf32>
    %240 = vector.extract_strided_slice %109 {offsets = [4, 0], sizes = [1, 128], strides = [1, 1]} : vector<8x128xf32> to vector<1x128xf32>
    %241 = vector.broadcast %240 : vector<1x128xf32> to vector<16x128xf32>
    %242 = arith.mulf %241, %231 : vector<16x128xf32>
    %243 = arith.addf %239, %242 : vector<16x128xf32>
    %244 = arith.mulf %243, %238 : vector<16x128xf32>
    %cst_42 = arith.constant dense<0.000000e+00> : vector<128xf32>
    %245 = vector.multi_reduction <add>, %244, %cst_42 [0] : vector<16x128xf32> to vector<128xf32>
    %246 = vector.shape_cast %245 : vector<128xf32> to vector<1x128xf32>
    %247 = vector.extract_strided_slice %105 {offsets = [5, 0], sizes = [1, 128], strides = [1, 1]} : vector<8x128xf32> to vector<1x128xf32>
    %248 = vector.broadcast %247 : vector<1x128xf32> to vector<16x128xf32>
    %249 = arith.mulf %248, %113 : vector<16x128xf32>
    %250 = math.exp %249 : vector<16x128xf32>
    %251 = vector.extract_strided_slice %114 {offsets = [0, 5], sizes = [16, 1], strides = [1, 1]} : vector<16x16xf32> to vector<16x1xf32>
    %252 = vector.shape_cast %251 : vector<16x1xf32> to vector<16x1xf32>
    %253 = vector.broadcast %252 : vector<16x1xf32> to vector<16x64xf32>
    %254 = vector.extract_strided_slice %114 {offsets = [0, 13], sizes = [16, 1], strides = [1, 1]} : vector<16x16xf32> to vector<16x1xf32>
    %255 = vector.shape_cast %254 : vector<16x1xf32> to vector<16x1xf32>
    %256 = vector.broadcast %255 : vector<16x1xf32> to vector<16x64xf32>
    %257 = tpu.concatenate %253, %256 in 1 : vector<16x64xf32>, vector<16x64xf32> -> vector<16x128xf32>
    %258 = vector.extract_strided_slice %115 {offsets = [0, 5], sizes = [16, 1], strides = [1, 1]} : vector<16x16xf32> to vector<16x1xf32>
    %259 = vector.shape_cast %258 : vector<16x1xf32> to vector<16x1xf32>
    %260 = vector.broadcast %259 : vector<16x1xf32> to vector<16x64xf32>
    %261 = vector.extract_strided_slice %115 {offsets = [0, 13], sizes = [16, 1], strides = [1, 1]} : vector<16x16xf32> to vector<16x1xf32>
    %262 = vector.shape_cast %261 : vector<16x1xf32> to vector<16x1xf32>
    %263 = vector.broadcast %262 : vector<16x1xf32> to vector<16x64xf32>
    %264 = tpu.concatenate %260, %263 in 1 : vector<16x64xf32>, vector<16x64xf32> -> vector<16x128xf32>
    %265 = arith.mulf %250, %243 : vector<16x128xf32>
    %266 = vector.extract_strided_slice %109 {offsets = [5, 0], sizes = [1, 128], strides = [1, 1]} : vector<8x128xf32> to vector<1x128xf32>
    %267 = vector.broadcast %266 : vector<1x128xf32> to vector<16x128xf32>
    %268 = arith.mulf %267, %257 : vector<16x128xf32>
    %269 = arith.addf %265, %268 : vector<16x128xf32>
    %270 = arith.mulf %269, %264 : vector<16x128xf32>
    %cst_43 = arith.constant dense<0.000000e+00> : vector<128xf32>
    %271 = vector.multi_reduction <add>, %270, %cst_43 [0] : vector<16x128xf32> to vector<128xf32>
    %272 = vector.shape_cast %271 : vector<128xf32> to vector<1x128xf32>
    %273 = vector.extract_strided_slice %105 {offsets = [6, 0], sizes = [1, 128], strides = [1, 1]} : vector<8x128xf32> to vector<1x128xf32>
    %274 = vector.broadcast %273 : vector<1x128xf32> to vector<16x128xf32>
    %275 = arith.mulf %274, %113 : vector<16x128xf32>
    %276 = math.exp %275 : vector<16x128xf32>
    %277 = vector.extract_strided_slice %114 {offsets = [0, 6], sizes = [16, 1], strides = [1, 1]} : vector<16x16xf32> to vector<16x1xf32>
    %278 = vector.shape_cast %277 : vector<16x1xf32> to vector<16x1xf32>
    %279 = vector.broadcast %278 : vector<16x1xf32> to vector<16x64xf32>
    %280 = vector.extract_strided_slice %114 {offsets = [0, 14], sizes = [16, 1], strides = [1, 1]} : vector<16x16xf32> to vector<16x1xf32>
    %281 = vector.shape_cast %280 : vector<16x1xf32> to vector<16x1xf32>
    %282 = vector.broadcast %281 : vector<16x1xf32> to vector<16x64xf32>
    %283 = tpu.concatenate %279, %282 in 1 : vector<16x64xf32>, vector<16x64xf32> -> vector<16x128xf32>
    %284 = vector.extract_strided_slice %115 {offsets = [0, 6], sizes = [16, 1], strides = [1, 1]} : vector<16x16xf32> to vector<16x1xf32>
    %285 = vector.shape_cast %284 : vector<16x1xf32> to vector<16x1xf32>
    %286 = vector.broadcast %285 : vector<16x1xf32> to vector<16x64xf32>
    %287 = vector.extract_strided_slice %115 {offsets = [0, 14], sizes = [16, 1], strides = [1, 1]} : vector<16x16xf32> to vector<16x1xf32>
    %288 = vector.shape_cast %287 : vector<16x1xf32> to vector<16x1xf32>
    %289 = vector.broadcast %288 : vector<16x1xf32> to vector<16x64xf32>
    %290 = tpu.concatenate %286, %289 in 1 : vector<16x64xf32>, vector<16x64xf32> -> vector<16x128xf32>
    %291 = arith.mulf %276, %269 : vector<16x128xf32>
    %292 = vector.extract_strided_slice %109 {offsets = [6, 0], sizes = [1, 128], strides = [1, 1]} : vector<8x128xf32> to vector<1x128xf32>
    %293 = vector.broadcast %292 : vector<1x128xf32> to vector<16x128xf32>
    %294 = arith.mulf %293, %283 : vector<16x128xf32>
    %295 = arith.addf %291, %294 : vector<16x128xf32>
    %296 = arith.mulf %295, %290 : vector<16x128xf32>
    %cst_44 = arith.constant dense<0.000000e+00> : vector<128xf32>
    %297 = vector.multi_reduction <add>, %296, %cst_44 [0] : vector<16x128xf32> to vector<128xf32>
    %298 = vector.shape_cast %297 : vector<128xf32> to vector<1x128xf32>
    %299 = vector.extract_strided_slice %105 {offsets = [7, 0], sizes = [1, 128], strides = [1, 1]} : vector<8x128xf32> to vector<1x128xf32>
    %300 = vector.broadcast %299 : vector<1x128xf32> to vector<16x128xf32>
    %301 = arith.mulf %300, %113 : vector<16x128xf32>
    %302 = math.exp %301 : vector<16x128xf32>
    %303 = vector.extract_strided_slice %114 {offsets = [0, 7], sizes = [16, 1], strides = [1, 1]} : vector<16x16xf32> to vector<16x1xf32>
    %304 = vector.shape_cast %303 : vector<16x1xf32> to vector<16x1xf32>
    %305 = vector.broadcast %304 : vector<16x1xf32> to vector<16x64xf32>
    %306 = vector.extract_strided_slice %114 {offsets = [0, 15], sizes = [16, 1], strides = [1, 1]} : vector<16x16xf32> to vector<16x1xf32>
    %307 = vector.shape_cast %306 : vector<16x1xf32> to vector<16x1xf32>
    %308 = vector.broadcast %307 : vector<16x1xf32> to vector<16x64xf32>
    %309 = tpu.concatenate %305, %308 in 1 : vector<16x64xf32>, vector<16x64xf32> -> vector<16x128xf32>
    %310 = vector.extract_strided_slice %115 {offsets = [0, 7], sizes = [16, 1], strides = [1, 1]} : vector<16x16xf32> to vector<16x1xf32>
    %311 = vector.shape_cast %310 : vector<16x1xf32> to vector<16x1xf32>
    %312 = vector.broadcast %311 : vector<16x1xf32> to vector<16x64xf32>
    %313 = vector.extract_strided_slice %115 {offsets = [0, 15], sizes = [16, 1], strides = [1, 1]} : vector<16x16xf32> to vector<16x1xf32>
    %314 = vector.shape_cast %313 : vector<16x1xf32> to vector<16x1xf32>
    %315 = vector.broadcast %314 : vector<16x1xf32> to vector<16x64xf32>
    %316 = tpu.concatenate %312, %315 in 1 : vector<16x64xf32>, vector<16x64xf32> -> vector<16x128xf32>
    %317 = arith.mulf %302, %295 : vector<16x128xf32>
    %318 = vector.extract_strided_slice %109 {offsets = [7, 0], sizes = [1, 128], strides = [1, 1]} : vector<8x128xf32> to vector<1x128xf32>
    %319 = vector.broadcast %318 : vector<1x128xf32> to vector<16x128xf32>
    %320 = arith.mulf %319, %309 : vector<16x128xf32>
    %321 = arith.addf %317, %320 : vector<16x128xf32>
    %322 = arith.mulf %321, %316 : vector<16x128xf32>
    %cst_45 = arith.constant dense<0.000000e+00> : vector<128xf32>
    %323 = vector.multi_reduction <add>, %322, %cst_45 [0] : vector<16x128xf32> to vector<128xf32>
    %324 = vector.shape_cast %323 : vector<128xf32> to vector<1x128xf32>
    %325 = tpu.concatenate %142, %168, %194, %220, %246, %272, %298, %324 in 0 : vector<1x128xf32>, vector<1x128xf32>, vector<1x128xf32>, vector<1x128xf32>, vector<1x128xf32>, vector<1x128xf32>, vector<1x128xf32>, vector<1x128xf32> -> vector<8x128xf32>
    %326 = vector.extract_strided_slice %325 {offsets = [0, 0], sizes = [8, 64], strides = [1, 1]} : vector<8x128xf32> to vector<8x64xf32>
    %327 = vector.extract_strided_slice %325 {offsets = [0, 64], sizes = [8, 64], strides = [1, 1]} : vector<8x128xf32> to vector<8x64xf32>
    %328 = tpu.concatenate %326, %327 in 0 : vector<8x64xf32>, vector<8x64xf32> -> vector<16x64xf32>
    %c0_46 = arith.constant 0 : index
    %c0_47 = arith.constant 0 : index
    %329 = vector.load %arg9[%c0_46, %c0_47] : memref<1x64xf32, #tpu.memory_space<vmem>>, vector<1x64xf32>
    %330 = vector.broadcast %329 : vector<1x64xf32> to vector<16x64xf32>
    %331 = arith.mulf %86, %330 : vector<16x64xf32>
    %332 = arith.addf %328, %331 : vector<16x64xf32>
    %cst_48 = arith.constant 0.000000e+00 : f32
    %333 = vector.broadcast %cst_48 : f32 to vector<16x64xf32>
    %334 = arith.subf %333, %29 : vector<16x64xf32>
    %335 = math.exp %334 : vector<16x64xf32>
    %cst_49 = arith.constant 1.000000e+00 : f32
    %336 = vector.broadcast %cst_49 : f32 to vector<16x64xf32>
    %337 = arith.addf %336, %335 : vector<16x64xf32>
    %cst_50 = arith.constant 1.000000e+00 : f32
    %338 = vector.broadcast %cst_50 : f32 to vector<16x64xf32>
    %339 = arith.divf %338, %337 : vector<16x64xf32>
    %340 = arith.mulf %29, %339 : vector<16x64xf32>
    %341 = arith.mulf %332, %340 : vector<16x64xf32>
    %342 = arith.truncf %341 : vector<16x64xf32> to vector<16x64xbf16>
    %c0_51 = arith.constant 0 : index
    %c0_52 = arith.constant 0 : index
    %343 = vector.load %arg10[%c0_51, %c0_52] : memref<64x32xbf16, #tpu.memory_space<vmem>>, vector<64x32xbf16>
    %cst_53 = arith.constant dense<0.000000e+00> : vector<16x32xf32>
    %344 = tpu.matmul %342, %343, %cst_53 {dimension_numbers = #tpu.dot_dimension_numbers<[1], [0], [0], [1], [0, 0, 1, 1], [], []>} : vector<16x64xbf16>, vector<64x32xbf16>, vector<16x32xf32> -> vector<16x32xf32>
    %345 = arith.addf %0, %344 : vector<16x32xf32>
    %c0_54 = arith.constant 0 : index
    %c0_55 = arith.constant 0 : index
    %346 = vector.load %arg11[%c0_54, %c0_55] : memref<16x32xf32, #tpu.memory_space<vmem>>, vector<16x32xf32>
    tpu.vector_store %arg11[%c0_54, %c0_55], %345 {strides = array<i32>} : memref<16x32xf32, #tpu.memory_space<vmem>>, vector<16x32xf32>,
    return
  }
}

</mosaic_0001>

<bundles_post_ra>
// kernel: tpu_custom_call.1
= control target key start
LH: loop header
LB: loop body
LE: loop exit
PB: predicated region body
PF: predicated region fallthrough
CT: control target
= control target key end

     0   :  { %16 = vsyncpa [#allocation3], 0  ;;  %s2125_s0 = inlined_call_operand.vmem [shape: f32[16,32], index: 0, kind: input, shape index: {}]   ;;  %s2126_s1 = inlined_call_operand.vmem [shape: f32[1,32], index: 1, kind: input, shape index: {}]   ;;  %s2127_s2 = inlined_call_operand.hbm [shape: f32[1,32], index: 2, kind: input, shape index: {}]   ;;  %s2128_s3 = inlined_call_operand.hbm [shape: bf16[32,128], index: 3, kind: input, shape index: {}]   ;;  %s2129_s4 = inlined_call_operand.vmem [shape: f32[4,64], index: 4, kind: input, shape index: {}]   ;;  %s2130_s5 = inlined_call_operand.hbm [shape: f32[1,64], index: 5, kind: input, shape index: {}]   ;;  %s2131_s6 = inlined_call_operand.vmem [shape: bf16[64,96], index: 6, kind: input, shape index: {}]   ;;  %s2132_s7 = inlined_call_operand.vmem [shape: f32[1,64], index: 7, kind: input, shape index: {}]   ;;  %s2133_s8 = inlined_call_operand.hbm [shape: f32[16,128], index: 8, kind: input, shape index: {}]   ;;  %s2134_s9 = inlined_call_operand.vmem [shape: f32[1,64], index: 9, kind: input, shape index: {}]   ;;  %s2135_s10 = inlined_call_operand.vmem [shape: bf16[64,32], index: 10, kind: input, shape index: {}]   ;;  %s2136_s11 = inlined_call_operand.hbm [shape: f32[16,32], index: 11, kind: output, shape index: {}]  }
   0x1   :  { %17 = vsyncpa [#allocation6], 0 }
   0x2   :  { %18 = vsyncpa [#allocation9], 0  ;;  %s39_s19 = sshll.u32 %s2128_s3, 4  ;;  %s40_s19 = int_to_ptr.hbm [resolvable:$true] %s39_s19 }
   0x3   :  { %19 = vsyncpa [#allocation4], 0  ;;  %s1563_s20 = smov [#allocation5]   ;;  %s29_s24 = sshll.u32 %s2127_s2, 4  ;;  %s30_s24 = int_to_ptr.hbm [resolvable:$true] %s29_s24 }
   0x4   :  { %s41_s21 = sshll.u32 %s1563_s20, 4  ;;  %s1564_s25 = smov 64   ;;  %s42_s21 = int_to_ptr.vmem [resolvable:$true] %s41_s21 }
   0x5   :  { %s1565_s26 = smov 4   ;;  %s1566_s27 = smov [#allocation2]  }
   0x6   :  { %47 = dma.hbm_to_vmem [thread:$0]  %s40_s19, 256, %s42_s21, [#allocation6], %s1564_s25, %s1564_s25, %s1565_s26  }
   0x7   :  { %s31_s28 = sshll.u32 %s1566_s27, 4  ;;  %s55_s3 = sshll.u32 %s2130_s5, 4  ;;  %s32_s28 = int_to_ptr.vmem [resolvable:$true] %s31_s28  ;;  %s56_s3 = int_to_ptr.hbm [resolvable:$true] %s55_s3 }
   0x8   :  { %34 = dma.hbm_to_vmem [thread:$0]  %s30_s24, 16, %s32_s28, [#allocation3]  }
   0x9   :  { %s69_s14 = sshll.u32 %s2133_s8, 4  ;;  %s1567_s2 = smov [#allocation7]   ;;  %s70_s14 = int_to_ptr.hbm [resolvable:$true] %s69_s14 }
   0xa   :  { %s57_s15 = sshll.u32 %s1567_s2, 4  ;;  %s1568_s16 = smov [#allocation8]   ;;  %s58_s15 = int_to_ptr.vmem [resolvable:$true] %s57_s15 }
   0xb   :  { %60 = dma.hbm_to_vmem [thread:$0]  %s56_s3, 16, %s58_s15, [#allocation6]  }
   0xc   :  { %s71_s17 = sshll.u32 %s1568_s16, 4  ;;  %s1569_s18 = smov 128   ;;  %s72_s17 = int_to_ptr.vmem [resolvable:$true] %s71_s17 }
   0xd   :  { %s1570_s19 = smov 8  }
   0xe   :  { %77 = dma.hbm_to_vmem [thread:$0]  %s70_s14, 256, %s72_s17, [#allocation9], %s1569_s18, %s1569_s18, %s1570_s19  }
   0xf   :  { %1555 = dma.done.wait [#allocation3], 16  }
  0x10   :  { %1556 = vsyncadd [#allocation3], 4294967280 }
  0x11   :  { %1557 = dma.done.wait [#allocation6], 272  }
  0x12   :  { %1558 = vsyncadd [#allocation6], 4294967024 }
  0x13   :  { %1559 = dma.done.wait [#allocation9], 256  }
  0x14   :  { %1560 = vsyncadd [#allocation9], 4294967040  ;;  %vm101_vm0 = vcmask 261120   ;;  %v99_v0 = vld [vmem:[%s2125_s0] sm:$0xff]  ;;  %v100_v2 = vld [vmem:[%s2125_s0 + $0x8] sm:$0xff]  ;;  %v1571_v4 = vmov 32.0   ;;  %v199_v55 = vlaneseq }
  0x15   :  { %v102_v1 = vsel %vm101_vm0, %v99_v0, 0.0  ;;  %v105_v3 = vsel %vm101_vm0, %v100_v2, 0.0  ;;  %1363 = vrcp.f32 %v1571_v4  ;;  %v1253_v21 = vld [vmem:[#allocation5 + $0x8] sm:$0xff]  ;;  %v1252_v23 = vld [vmem:[#allocation5] sm:$0xff]  ;;  %v1354_v42 = vld [vmem:[%s2126_s1] ss:$0 sm:$0xff] }
  0x16   :  { %103 = vadd.xlane.f32.xlu0 %v102_v1  ;;  %191 = vmatpush.bf16.msra.mxu0 %v1253_v21  ;;  %v1355_v47 = vld [vmem:[#allocation2] ss:$0 sm:$0xff]  ;;  %v1257_v52 = vld [vmem:[%s2131_s6 + $0x18] sm:$0xff]  ;;  %v1256_v53 = vld [vmem:[%s2131_s6 + $0x10] sm:$0xff]  ;;  %vm209_vm8 = vcmask 1042432   ;;  %v200_v58 = vshrl.u32 %v199_v55, 7 }
  0x17   :  { %435 = vmatpush.bf16.msra.mxu1 %v1257_v52  ;;  %v1357_v61 = vld [vmem:[%s2129_s4 + $0x3] ss:$0 sm:$0xff]  ;;  %vm236_vm9 = vcmask 1045504   ;;  %vm267_vm10 = vcmask 1046528   ;;  %v1359_v1 = vld [vmem:[%s2129_s4 + $0x2] ss:$0 sm:$0xff] }
  0x18   :  { %vm229_vm11 = vcmp.ge.s32.totalorder %v200_v58, 1  ;;  %vm261_vm12 = vcmp.ge.s32.totalorder %v200_v58, 2  ;;  %vm292_vm13 = vcmp.ge.s32.totalorder %v200_v58, 3  ;;  %v1254_v58 = vld [vmem:[%s2131_s6] sm:$0xff]  ;;  %s1572_s8 = smov 48   ;;  %s1193_s12 = sshll.u32 %s2136_s11, 4  ;;  %s1194_s12 = int_to_ptr.hbm [resolvable:$true] %s1193_s12 }
  0x1a   :  { %192 = vmatpush.bf16.msra.mxu0 %v1252_v23 }
  0x1b   :  { %v1364_v5 = vpop.eup %1363  ;;  %436 = vmatpush.bf16.msra.mxu1 %v1256_v53  ;;  %v1255_v53 = vld [vmem:[%s2131_s6 + $0x8] sm:$0xff] }
  0x1c   :  { %v109_v6 = vmul.f32 32.0, %v1364_v5  ;;  %vm113_vm1 = vweird.f32 %v1364_v5 }
  0x1e   :  { %106 = vadd.xlane.f32.xlu0 %v105_v3  ;;  %v110_v7 = vsub.f32 1.0, %v109_v6 }
  0x1f   :  { %437 = vmatpush.bf16.msra.mxu1 %v1255_v53 }
  0x20   :  { %v111_v8 = vmul.f32 %v1364_v5, %v110_v7 }
  0x22   :  { %v112_v9 = vadd.f32 %v1364_v5, %v111_v8 }
  0x23   :  { %438 = vmatpush.bf16.msra.mxu1 %v1254_v58 }
  0x24   :  { %v114_v10 = vsel %vm113_vm1, %v1364_v5, %v112_v9  ;;  %v1360_v5 = vld [vmem:[%s2129_s4 + $0x1] ss:$0 sm:$0xff] }
  0x89   :  { %v104_v11 = vpop.xlane.xlu0 %103 }
  0x8a   :  { %v115_v12 = vmul.f32 %v114_v10, %v104_v11 }
  0x8c   :  { %v117_v13 = vsub.f32 %v99_v0, %v115_v12 }
  0x8e   :  { %v119_v14 = vmul.f32 %v117_v13, %v117_v13 }
  0x90   :  { %v121_v15 = vsel %vm101_vm0, %v119_v14, 0.0 }
  0x91   :  { %122 = vadd.xlane.f32.xlu1 %v121_v15  ;;  %v107_v16 = vpop.xlane.xlu0 %106  ;;  %v1356_v15 = vld [vmem:[#allocation7] ss:$0 sm:$0xff] }
  0x92   :  { %v116_v17 = vmul.f32 %v114_v10, %v107_v16  ;;  %v1358_v16 = vld [vmem:[%s2129_s4] ss:$0 sm:$0xff] }
  0x94   :  { %v118_v18 = vsub.f32 %v100_v2, %v116_v17 }
  0x96   :  { %v120_v19 = vmul.f32 %v118_v18, %v118_v18 }
  0x98   :  { %v124_v20 = vsel %vm101_vm0, %v120_v19, 0.0 }
  0x99   :  { %125 = vadd.xlane.f32.xlu1 %v124_v20 }
 0x104   :  { %v123_v22 = vpop.xlane.xlu1 %122 }
 0x105   :  { %v127_v24 = vmul.f32 %v123_v22, %v114_v10 }
 0x107   :  { %v129_v25 = vadd.f32 1e-06, %v127_v24 }
 0x109   :  { %1365 = vrsqrt.f32 %v129_v25  ;;  %vm137_vm3 = vweird.f32 %v129_v25 }
 0x10c   :  { %v126_v26 = vpop.xlane.xlu1 %125 }
 0x10d   :  { %v128_v27 = vmul.f32 %v126_v26, %v114_v10 }
 0x10f   :  { %v1366_v28 = vpop.eup %1365  ;;  %v130_v29 = vadd.f32 1e-06, %v128_v27 }
 0x110   :  { %v132_v30 = vmul.f32 %v1366_v28, %v129_v25  ;;  %vm138_vm2 = vweird.f32 %v1366_v28 }
 0x111   :  { %1367 = vrsqrt.f32 %v130_v29  ;;  %vm139_vm4 = vmor %vm137_vm3, %vm138_vm2  ;;  %vm147_vm6 = vweird.f32 %v130_v29 }
 0x112   :  { %v133_v31 = vmul.f32 %v1366_v28, %v132_v30 }
 0x114   :  { %v134_v32 = vmul.f32 0.5, %v133_v31 }
 0x116   :  { %v135_v33 = vsub.f32 1.5, %v134_v32 }
 0x117   :  { %v1368_v34 = vpop.eup %1367 }
 0x118   :  { %v136_v35 = vmul.f32 %v1366_v28, %v135_v33  ;;  %v142_v36 = vmul.f32 %v1368_v34, %v130_v29  ;;  %vm148_vm5 = vweird.f32 %v1368_v34 }
 0x119   :  { %vm149_vm7 = vmor %vm147_vm6, %vm148_vm5 }
 0x11a   :  { %v143_v37 = vmul.f32 %v1368_v34, %v142_v36  ;;  %v140_v38 = vsel %vm139_vm4, %v1366_v28, %v136_v35 }
 0x11b   :  { %v151_v41 = vmul.f32 %v140_v38, %v117_v13 }
 0x11c   :  { %v144_v39 = vmul.f32 0.5, %v143_v37 }
 0x11d   :  { %v157_v46 = vmul.f32 %v1354_v42, %v151_v41 }
 0x11e   :  { %v145_v40 = vsub.f32 1.5, %v144_v39 }
 0x11f   :  { %v163_v49 = vadd.f32 %v1355_v47, %v157_v46 }
 0x120   :  { %v146_v43 = vmul.f32 %v1368_v34, %v145_v40 }
 0x122   :  { %v150_v44 = vsel %vm149_vm7, %v1368_v34, %v146_v43 }
 0x123   :  { %v152_v45 = vmul.f32 %v150_v44, %v118_v18 }
 0x125   :  { %v158_v48 = vmul.f32 %v1354_v42, %v152_v45 }
 0x127   :  { %v164_v50 = vadd.f32 %v1355_v47, %v158_v48 }
 0x129   :  { %v165_v51 = vpack.c.bf16 %v164_v50, %v163_v49 }
 0x12b   :  { %1216 = vmatmul.msk.bf16.vlgmr.msra.gmra.mxu0 %vm101_vm0, %v165_v51 }
 0x1a8   :  { %v1687_v54 = vpop.f32.mrf.mxu0 }
 0x1a9   :  { %v210_v56 = vrot.slane %v1687_v54, 5 }
 0x1ab   :  { %v216_v59 = vsel %vm209_vm8, 0.0, %v210_v56 }
 0x1ac   :  { %v268_v2 = vrot.slane %v216_v59, 1  ;;  %v237_v6 = vrot.slane %v216_v59, 2  ;;  %v223_v19 = vmul.f32 %v1357_v61, %v216_v59  ;;  %v298_v20 = vsel %vm292_vm13, %v216_v59, 0.0 }
 0x1ad   :  { %v302_v32 = vmul.f32 %v1358_v16, %v298_v20 }
 0x1ae   :  { %v226_v31 = vadd.f32 %v1356_v15, %v223_v19 }
 0x1af   :  { %v306_v42 = vrot.slane %v302_v32, 5 }
 0x1b0   :  { %v1690_v57 = vpop.f32.mrf.mxu0 }
 0x1b1   :  { %v211_v60 = vrot.slane %v1690_v57, 5 }
 0x1b3   :  { %v212_v62 = vsel %vm209_vm8, %v210_v56, %v211_v60  ;;  %v240_v63 = vrot.slane %v211_v60, 2  ;;  %v271_v0 = vrot.slane %v211_v60, 1  ;;  %v225_v7 = vmul.f32 %v1357_v61, %v211_v60 }
 0x1b4   :  { %v238_v3 = vrot.slane %v212_v62, 2  ;;  %v269_v4 = vrot.slane %v212_v62, 1  ;;  %v299_v14 = vsel %vm292_vm13, %v212_v62, 0.0  ;;  %v224_v26 = vmul.f32 %v1357_v61, %v212_v62 }
 0x1b5   :  { %v228_v22 = vadd.f32 %v1356_v15, %v225_v7  ;;  %v303_v25 = vmul.f32 %v1358_v16, %v299_v14 }
 0x1b6   :  { %v241_v8 = vsel %vm236_vm9, %v238_v3, %v240_v63  ;;  %v270_v9 = vsel %vm267_vm10, %v268_v2, %v269_v4  ;;  %v272_v10 = vsel %vm267_vm10, %v269_v4, %v271_v0  ;;  %v239_v21 = vsel %vm236_vm9, %v237_v6, %v238_v3 }
 0x1b7   :  { %v245_v11 = vsel %vm229_vm11, %v241_v8, 0.0  ;;  %v275_v12 = vsel %vm261_vm12, %v270_v9, 0.0  ;;  %v276_v13 = vsel %vm261_vm12, %v272_v10, 0.0  ;;  %v244_v27 = vsel %vm229_vm11, %v239_v21, 0.0 }
 0x1b8   :  { %v249_v17 = vmul.f32 %v1359_v1, %v245_v11  ;;  %v280_v18 = vmul.f32 %v1360_v5, %v276_v13  ;;  %v279_v24 = vmul.f32 %v1360_v5, %v275_v12  ;;  %v248_v30 = vmul.f32 %v1359_v1, %v244_v27 }
 0x1b9   :  { %v307_v35 = vrot.slane %v303_v25, 5  ;;  %v227_v37 = vadd.f32 %v1356_v15, %v224_v26 }
 0x1ba   :  { %v253_v23 = vrot.slane %v249_v17, 5  ;;  %v284_v29 = vrot.slane %v280_v18, 5  ;;  %v283_v33 = vrot.slane %v279_v24, 5  ;;  %v252_v36 = vrot.slane %v248_v30, 5 }
 0x1bb   :  { %v308_v48 = vsel %vm209_vm8, %v306_v42, %v307_v35 }
 0x1bc   :  { %v260_v28 = vadd.f32 %v253_v23, %v228_v22  ;;  %v258_v39 = vadd.f32 %v252_v36, %v226_v31  ;;  %v254_v40 = vsel %vm209_vm8, %v252_v36, %v253_v23  ;;  %v285_v45 = vsel %vm209_vm8, %v283_v33, %v284_v29 }
 0x1bd   :  { %v259_v41 = vadd.f32 %v254_v40, %v227_v37 }
 0x1be   :  { %v291_v34 = vadd.f32 %v284_v29, %v260_v28  ;;  %v289_v44 = vadd.f32 %v283_v33, %v258_v39 }
 0x1bf   :  { %v290_v46 = vadd.f32 %v285_v45, %v259_v41 }
 0x1c0   :  { %v314_v38 = vadd.f32 %v307_v35, %v291_v34  ;;  %v1716_v49 = vadd.f32 %v306_v42, %v289_v44 }
 0x1c1   :  { %v1718_v50 = vadd.f32 %v308_v48, %v290_v46 }
 0x1c2   :  { %v317_v43 = vsub.f32 0.0, %v314_v38  ;;  %v315_v51 = vsub.f32 0.0, %v1716_v49 }
 0x1c3   :  { %v316_v52 = vsub.f32 0.0, %v1718_v50 }
 0x1c4   :  { %v322_v47 = vmul.f32 1.442695, %v317_v43  ;;  %v318_v55 = vmul.f32 1.442695, %v315_v51 }
 0x1c5   :  { %v320_v56 = vmul.f32 1.442695, %v316_v52 }
 0x1c6   :  { %1369 = vpow2.f32 %v322_v47  ;;  %v1361_v47 = vld [vmem:[%s2132_s7] ss:$0 sm:$0xff] }
 0x1c7   :  { %1371 = vpow2.f32 %v318_v55 }
 0x1c8   :  { %1373 = vpow2.f32 %v320_v56 }
 0x1cc   :  { %v1370_v59 = vpop.eup %1369 }
 0x1cd   :  { %v326_v60 = vadd.f32 1.0, %v1370_v59  ;;  %v1372_v61 = vpop.eup %1371 }
 0x1ce   :  { %v1374_v62 = vpop.eup %1373  ;;  %v324_v63 = vadd.f32 1.0, %v1372_v61 }
 0x1cf   :  { %1375 = vrcp.f32 %v326_v60  ;;  %v325_v0 = vadd.f32 1.0, %v1374_v62  ;;  %v366_v4 = vand.u32 2147483647, %v326_v60  ;;  %v368_v6 = vand.u32 2147483648, %v326_v60 }
 0x1d0   :  { %1377 = vrcp.f32 %v324_v63  ;;  %vm362_vm15 = vweird.f32 %v326_v60  ;;  %v336_v15 = vand.u32 2147483647, %v324_v63  ;;  %v338_v16 = vand.u32 2147483648, %v324_v63 }
 0x1d1   :  { %1379 = vrcp.f32 %v325_v0  ;;  %vm367_vm1 = vcmp.eq.f32.partialorder %v366_v4, 8.507059e+37  ;;  %v369_v13 = vor.u32 1.1754944e-38, %v368_v6  ;;  %v353_v18 = vand.u32 2147483648, %v325_v0 }
 0x1d2   :  { %v351_v22 = vand.u32 2147483647, %v325_v0  ;;  %vm332_vm5 = vweird.f32 %v324_v63  ;;  %vm347_vm6 = vweird.f32 %v325_v0  ;;  %v339_v26 = vor.u32 1.1754944e-38, %v338_v16 }
 0x1d3   :  { %v354_v28 = vor.u32 1.1754944e-38, %v353_v18  ;;  %vm337_vm12 = vcmp.eq.f32.partialorder %v336_v15, 8.507059e+37  ;;  %v1575_v4 = vmov 8   ;;  %v1583_v15 = vmov 7  }
 0x1d4   :  { %vm352_vm13 = vcmp.eq.f32.partialorder %v351_v22, 8.507059e+37  ;;  %v1584_v16 = vmov 13   ;;  %v1585_v18 = vmov 12  }
 0x1d5   :  { %v1376_v1 = vpop.eup %1375 }
 0x1d6   :  { %v358_v2 = vmul.f32 %v1376_v1, %v326_v60  ;;  %v1378_v5 = vpop.eup %1377  ;;  %vm363_vm14 = vweird.f32 %v1376_v1  ;;  %v1573_v60 = vmov 0  }
 0x1d7   :  { %v1380_v7 = vpop.eup %1379  ;;  %v328_v9 = vmul.f32 %v1378_v5, %v324_v63  ;;  %vm364_vm2 = vmor %vm362_vm15, %vm363_vm14  ;;  %vm333_vm3 = vweird.f32 %v1378_v5  ;;  %vm385_vm14 = vsmask.f32 6400  ;;  %vm427_vm15 = vcmask 523264   ;;  %1290 = vset.pattern.permute.xlu1 %v1573_v60 }
 0x1d8   :  { %v359_v3 = vsub.f32 1.0, %v358_v2  ;;  %v343_v10 = vmul.f32 %v1380_v7, %v325_v0  ;;  %vm348_vm4 = vweird.f32 %v1380_v7  ;;  %vm334_vm7 = vmor %vm332_vm5, %vm333_vm3  ;;  %vm482_vm3 = vcmask 1044480  }
 0x1d9   :  { %v329_v12 = vsub.f32 1.0, %v328_v9  ;;  %vm349_vm11 = vmor %vm347_vm6, %vm348_vm4  ;;  %v1577_v9 = vmov 11  }
 0x1da   :  { %v360_v8 = vmul.f32 %v1376_v1, %v359_v3  ;;  %v344_v14 = vsub.f32 1.0, %v343_v10  ;;  %v1574_v3 = vmov 10   ;;  %v1578_v10 = vmov 3  }
 0x1db   :  { %v330_v19 = vmul.f32 %v1378_v5, %v329_v12  ;;  %v1580_v12 = vmov 6  }
 0x1dc   :  { %v361_v11 = vadd.f32 %v1376_v1, %v360_v8  ;;  %v345_v21 = vmul.f32 %v1380_v7, %v344_v14  ;;  %v1582_v14 = vmov 9  }
 0x1dd   :  { %v331_v24 = vadd.f32 %v1378_v5, %v330_v19 }
 0x1de   :  { %v365_v17 = vsel %vm364_vm2, %v1376_v1, %v361_v11  ;;  %v346_v25 = vadd.f32 %v1380_v7, %v345_v21  ;;  %v1579_v11 = vmov 1  }
 0x1df   :  { %v370_v20 = vsel %vm367_vm1, %v369_v13, %v365_v17  ;;  %v335_v29 = vsel %vm334_vm7, %v1378_v5, %v331_v24  ;;  %v1581_v13 = vmov 5  }
 0x1e0   :  { %v1728_v23 = vmul.f32 %v370_v20, %v314_v38  ;;  %v350_v30 = vsel %vm349_vm11, %v1380_v7, %v346_v25  ;;  %v340_v31 = vsel %vm337_vm12, %v339_v26, %v335_v29  ;;  %v1576_v7 = vmov 2   ;;  %v488_v25 = vld [vmem:[#allocation8] sm:$0xff] }
 0x1e1   :  { %v355_v32 = vsel %vm352_vm13, %v354_v28, %v350_v30  ;;  %v1735_v33 = vmul.f32 %v340_v31, %v1716_v49  ;;  %v1586_v20 = vmov 4   ;;  %v1587_v26 = vmov 14  }
 0x1e2   :  { %474 = vrot.lane.b32.xlu0 %v1728_v23, %s1564_s25  ;;  %v376_v27 = vpack.c.bf16 %v1728_v23, %v1728_v23  ;;  %v1738_v36 = vmul.f32 %v355_v32, %v1718_v50 }
 0x1e4   :  { %v395_v34 = vshrl.u32 %v376_v27, 16  ;;  %v398_v35 = vshll.u32 %v376_v27, 16  ;;  %472 = vrot.lane.b32.xlu2 %v1738_v36, %s1564_s25  ;;  %v375_v37 = vpack.c.bf16 %v1738_v36, %v1735_v33  ;;  %v490_v27 = vmul.f32 1.442695, %v488_v25 }
 0x1e6   :  { %v397_v38 = vrot.slane %v395_v34, 1  ;;  %v400_v39 = vrot.slane %v398_v35, 2  ;;  %v387_v40 = vshrl.u32 %v375_v37, 16  ;;  %v390_v41 = vshll.u32 %v375_v37, 16 }
 0x1e8   :  { %v389_v42 = vrot.slane %v387_v40, 1  ;;  %v392_v43 = vrot.slane %v390_v41, 2  ;;  %v401_v44 = vor.u32 %v400_v39, %v397_v38  ;;  %v1588_v39 = vmov 15  }
 0x1ea   :  { %v393_v45 = vor.u32 %v392_v43, %v389_v42 }
 0x1ec   :  { %v402_v46 = vsel %vm385_vm14, %v393_v45, %v401_v44 }
 0x1ed   :  { %1234 = vmatmul.msk.bf16.vlgmr.msra.gmra.mxu1 %vm427_vm15, %v402_v46 }
 0x23e   :  { %v1756_v62 = vpop.permute.xlu2 %472 }
 0x23f   :  { %v478_v45 = vsel %vm427_vm15, %v1735_v33, %v1756_v62 }
 0x254   :  { %v1754_v61 = vpop.permute.xlu0 %474 }
 0x255   :  { %v479_v43 = vsel %vm427_vm15, %v1738_v36, %v1754_v61 }
 0x256   :  { %v484_v46 = vrot.slane %v479_v43, 3 }
 0x26a   :  { %v440_v48 = vpop.f32.mrf.mxu1 }
 0x26b   :  { %v1748_v49 = vadd.f32 %v1361_v47, %v440_v48  ;;  %536 = vrot.lane.b32.xlu0 %v440_v48, %s1572_s8  ;;  %498 = vrot.lane.b32.xlu1 %v440_v48, %s1564_s25 }
 0x26d   :  { %v453_v19 = vmul.f32 1.442695, %v1748_v49  ;;  %vm451_vm2 = vcmp.gt.f32.partialorder %v1748_v49, 20.0 }
 0x272   :  { %v442_v50 = vpop.f32.mrf.mxu1 }
 0x273   :  { %v450_v51 = vadd.f32 %v1361_v47, %v442_v50  ;;  %538 = vrot.lane.b32.xlu1 %v442_v50, %s1572_s8  ;;  %500 = vrot.lane.b32.xlu2 %v442_v50, %s1564_s25 }
 0x275   :  { %v455_v52 = vmul.f32 1.442695, %v450_v51  ;;  %vm452_vm1 = vcmp.gt.f32.partialorder %v450_v51, 20.0 }
 0x277   :  { %1381 = vpow2.f32 %v455_v52 }
 0x27d   :  { %v1382_v53 = vpop.eup %1381 }
 0x27e   :  { %v458_v55 = vadd.f32 1.0, %v1382_v53 }
 0x280   :  { %1383 = vlog2.f32 %v458_v55 }
 0x281   :  { %1385 = vpow2.f32 %v453_v19 }
 0x286   :  { %v1384_v56 = vpop.eup %1383 }
 0x287   :  { %v462_v58 = vmul.f32 0.6931472, %v1384_v56  ;;  %v1386_v22 = vpop.eup %1385 }
 0x288   :  { %v457_v24 = vadd.f32 1.0, %v1386_v22 }
 0x289   :  { %v464_v59 = vsel %vm452_vm1, %v450_v51, %v462_v58  ;;  %vm1050_vm1 = vcmask 1040384  }
 0x28a   :  { %466 = vrot.lane.b32.xlu2 %v464_v59, %s1564_s25  ;;  %1387 = vlog2.f32 %v457_v24 }
 0x28b   :  { %1389 = vpow2.f32 %v490_v27 }
 0x290   :  { %v1388_v28 = vpop.eup %1387 }
 0x291   :  { %v460_v30 = vmul.f32 0.6931472, %v1388_v28  ;;  %v1390_v32 = vpop.eup %1389 }
 0x292   :  { %v1841_v37 = vsub.f32 0.0, %v1390_v32 }
 0x293   :  { %v463_v31 = vsel %vm451_vm2, %v1748_v49, %v460_v30  ;;  %v483_v49 = vrot.slane %v478_v45, 3  ;;  %vm1052_vm2 = vcmask 1041408  }
 0x295   :  { %v485_v50 = vsel %vm482_vm3, %v483_v49, %v484_v46 }
 0x2cd   :  { %v501_v1 = vpop.permute.xlu2 %500 }
 0x2dd   :  { %v537_v63 = vpop.permute.xlu0 %536  ;;  %v499_v0 = vpop.permute.xlu1 %498 }
 0x2de   :  { %542 = vxpose.xlu0.b32.start [1/2] (short) (narrow) %v537_v63, 16  ;;  %504 = vxpose.xlu2.b32.start [1/2] (short) (narrow) %v499_v0, 16  ;;  %v1083_v0 = vsub.f32 0.0, %v1687_v54 }
 0x2e0   :  { %v1085_v24 = vmul.f32 1.442695, %v1083_v0 }
 0x2e4   :  { %v1760_v5 = vpop.permute.xlu2 %466 }
 0x2e5   :  { %v539_v2 = vpop.permute.xlu1 %538  ;;  %v1836_v34 = vsel %vm427_vm15, %v463_v31, %v1760_v5 }
 0x2e6   :  { %543 = vxpose.xlu0.b32.end [2/2] (short) (narrow) %v539_v2, 16  ;;  %505 = vxpose.xlu2.b32.end [2/2] (short) (narrow) %v501_v1, 16  ;;  %v574_v38 = vperm.slane %v1836_v34, 0  ;;  %v637_v42 = vperm.slane %v1836_v34, 1  ;;  %v1866_v52 = vmul.f32 %v485_v50, %v1836_v34 }
 0x2e8   :  { %v575_v40 = vmul.f32 %v574_v38, %v1841_v37  ;;  %v638_v48 = vmul.f32 %v637_v42, %v1841_v37  ;;  %v623_v56 = vperm.slane %v1866_v52, 0  ;;  %v918_v5 = vperm.slane %v1866_v52, 5 }
 0x2e9   :  { %v800_v30 = vperm.slane %v1866_v52, 3  ;;  %v682_v50 = vperm.slane %v1866_v52, 1 }
 0x2ea   :  { %v577_v44 = vmul.f32 1.442695, %v575_v40  ;;  %v640_v51 = vmul.f32 1.442695, %v638_v48 }
 0x2ec   :  { %1391 = vpow2.f32 %v577_v44  ;;  %v696_v44 = vperm.slane %v1836_v34, 2 }
 0x2ed   :  { %1393 = vpow2.f32 %v640_v51 }
 0x2ee   :  { %1395 = vpow2.f32 %v1085_v24 }
 0x2f2   :  { %v1392_v55 = vpop.eup %1391 }
 0x2f3   :  { %v621_v63 = vmul.f32 0.0, %v1392_v55  ;;  %v1394_v2 = vpop.eup %1393 }
 0x2f4   :  { %v1396_v45 = vpop.eup %1395 }
 0x348   :  { %1299 = vset.pattern.permute.xlu2 %v1574_v3 }
 0x34d   :  { %1293 = vset.pattern.permute.xlu0 %v1575_v4 }
 0x377   :  { %v1762_v6 = vpop.trf.xlu2 }
 0x378   :  { %712 = vperm.xlu2 %1299, %v1762_v6   ;;  %583 = vperm.xlu1 %1290, %v1762_v6  }
 0x37f   :  { %v1798_v17 = vpop.trf.xlu2 }
 0x380   :  { %1291 = vset.pattern.permute.xlu1 %v1575_v4  ;;  %1300 = vset.pattern.permute.xlu2 %v1576_v7 }
 0x381   :  { %592 = vperm.xlu1 %1291, %v1762_v6  }
 0x382   :  { %v1769_v8 = vpop.trf.xlu0 }
 0x383   :  { %612 = vperm.xlu0 %1293, %v1769_v8   ;;  %722 = vperm.xlu2 %1300, %v1769_v8  }
 0x389   :  { %1292 = vset.pattern.permute.xlu1 %v1573_v60 }
 0x38a   :  { %603 = vperm.xlu1 %1292, %v1769_v8   ;;  %v1814_v21 = vpop.trf.xlu0 }
 0x38b   :  { %1302 = vset.pattern.permute.xlu0 %v1577_v9  ;;  %1301 = vset.pattern.permute.xlu2 %v1578_v10 }
 0x38c   :  { %771 = vperm.xlu0 %1302, %v1762_v6   ;;  %763 = vperm.xlu2 %1301, %v1762_v6  }
 0x392   :  { %1294 = vset.pattern.permute.xlu1 %v1579_v11 }
 0x393   :  { %645 = vperm.xlu1 %1294, %v1762_v6  }
 0x394   :  { %1307 = vset.pattern.permute.xlu0 %v1580_v12  ;;  %1305 = vset.pattern.permute.xlu2 %v1581_v13 }
 0x395   :  { %940 = vperm.xlu0 %1307, %v1762_v6   ;;  %881 = vperm.xlu2 %1305, %v1762_v6  }
 0x39b   :  { %1295 = vset.pattern.permute.xlu1 %v1582_v14 }
 0x39c   :  { %653 = vperm.xlu1 %1295, %v1762_v6  }
 0x39d   :  { %1312 = vset.pattern.permute.xlu0 %v1583_v15  ;;  %1306 = vset.pattern.permute.xlu2 %v1584_v16 }
 0x39e   :  { %999 = vperm.xlu0 %1312, %v1762_v6   ;;  %889 = vperm.xlu2 %1306, %v1762_v6  }
 0x3a4   :  { %1296 = vset.pattern.permute.xlu1 %v1579_v11 }
 0x3a5   :  { %663 = vperm.xlu1 %1296, %v1769_v8  }
 0x3a6   :  { %1317 = vset.pattern.permute.xlu0 %v1584_v16  ;;  %1310 = vset.pattern.permute.xlu2 %v1578_v10 }
 0x3a7   :  { %907 = vperm.xlu0 %1317, %v1769_v8   ;;  %781 = vperm.xlu2 %1310, %v1769_v8  }
 0x3ad   :  { %1297 = vset.pattern.permute.xlu1 %v1582_v14 }
 0x3ae   :  { %671 = vperm.xlu1 %1297, %v1769_v8  }
 0x3af   :  { %1311 = vset.pattern.permute.xlu2 %v1577_v9  ;;  %1333 = vset.pattern.permute.xlu0 %v1585_v18 }
 0x3b0   :  { %789 = vperm.xlu2 %1311, %v1769_v8   ;;  %834 = vperm.xlu0 %1333, %v1798_v17  }
 0x3b6   :  { %1298 = vset.pattern.permute.xlu1 %v1576_v7 }
 0x3b7   :  { %704 = vperm.xlu1 %1298, %v1762_v6  }
 0x3b8   :  { %1315 = vset.pattern.permute.xlu2 %v1585_v18  ;;  %1338 = vset.pattern.permute.xlu0 %v1574_v3 }
 0x3b9   :  { %848 = vperm.xlu2 %1315, %v1769_v8   ;;  %734 = vperm.xlu0 %1338, %v1814_v21  }
 0x3bf   :  { %1303 = vset.pattern.permute.xlu1 %v1586_v20 }
 0x3c0   :  { %822 = vperm.xlu1 %1303, %v1762_v6  }
 0x3c1   :  { %1316 = vset.pattern.permute.xlu2 %v1581_v13  ;;  %1343 = vset.pattern.permute.xlu0 %v1586_v20 }
 0x3c2   :  { %899 = vperm.xlu2 %1316, %v1769_v8   ;;  %844 = vperm.xlu0 %1343, %v1814_v21  }
 0x3c8   :  { %1304 = vset.pattern.permute.xlu1 %v1585_v18 }
 0x3c9   :  { %830 = vperm.xlu1 %1304, %v1762_v6  }
 0x3ca   :  { %1321 = vset.pattern.permute.xlu2 %v1575_v4  ;;  %1348 = vset.pattern.permute.xlu0 %v1587_v26 }
 0x3cb   :  { %596 = vperm.xlu2 %1321, %v1798_v17   ;;  %970 = vperm.xlu0 %1348, %v1814_v21  }
 0x3d1   :  { %1308 = vset.pattern.permute.xlu1 %v1587_v26 }
 0x3d2   :  { %948 = vperm.xlu1 %1308, %v1762_v6   ;;  %v1826_v29 = vpop.permute.xlu2 %712 }
 0x3d3   :  { %1331 = vset.pattern.permute.xlu2 %v1577_v9  ;;  %1353 = vset.pattern.permute.xlu0 %v1588_v39 }
 0x3d4   :  { %775 = vperm.xlu2 %1331, %v1798_v17  }
 0x3da   :  { %1309 = vset.pattern.permute.xlu1 %v1574_v3 }
 0x3db   :  { %730 = vperm.xlu1 %1309, %v1769_v8  }
 0x3dc   :  { %1332 = vset.pattern.permute.xlu2 %v1586_v20 }
 0x3dd   :  { %826 = vperm.xlu2 %1332, %v1798_v17   ;;  %v1839_v35 = vpop.permute.xlu2 %722 }
 0x3e3   :  { %1313 = vset.pattern.permute.xlu1 %v1588_v39 }
 0x3e4   :  { %1007 = vperm.xlu1 %1313, %v1762_v6  }
 0x3e5   :  { %1336 = vset.pattern.permute.xlu2 %v1580_v12 }
 0x3e6   :  { %944 = vperm.xlu2 %1336, %v1798_v17   ;;  %v764_v41 = vpop.permute.xlu2 %763 }
 0x3ea   :  { %v584_v47 = vpop.permute.xlu1 %583 }
 0x3ec   :  { %1314 = vset.pattern.permute.xlu1 %v1586_v20 }
 0x3ed   :  { %840 = vperm.xlu1 %1314, %v1769_v8  }
 0x3ee   :  { %1337 = vset.pattern.permute.xlu2 %v1587_v26 }
 0x3ef   :  { %952 = vperm.xlu2 %1337, %v1798_v17   ;;  %v882_v53 = vpop.permute.xlu2 %881 }
 0x3f3   :  { %v593_v58 = vpop.permute.xlu1 %592 }
 0x3f4   :  { %v599_v59 = vsel %vm427_vm15, %v584_v47, %v593_v58 }
 0x3f5   :  { %v624_v61 = vmul.f32 %v623_v56, %v599_v59  ;;  %1318 = vset.pattern.permute.xlu1 %v1580_v12  ;;  %v613_v62 = vpop.permute.xlu0 %612 }
 0x3f6   :  { %958 = vperm.xlu1 %1318, %v1769_v8  }
 0x3f7   :  { %1341 = vset.pattern.permute.xlu2 %v1583_v15  ;;  %v626_v1 = vadd.f32 %v624_v61, %v621_v63 }
 0x3f8   :  { %1003 = vperm.xlu2 %1341, %v1798_v17   ;;  %v890_v6 = vpop.permute.xlu2 %889 }
 0x3f9   :  { %v896_v19 = vsel %vm427_vm15, %v882_v53, %v890_v6  ;;  %v680_v20 = vmul.f32 %v1394_v2, %v626_v1 }
 0x3fa   :  { %v1882_v22 = vmul.f32 %v918_v5, %v896_v19  ;;  %v814_v19 = vperm.slane %v1836_v34, 4 }
 0x3fc   :  { %v604_v25 = vpop.permute.xlu1 %603 }
 0x3fd   :  { %v619_v27 = vsel %vm427_vm15, %v604_v25, %v613_v62 }
 0x3fe   :  { %v1885_v28 = vmul.f32 %v626_v1, %v619_v27  ;;  %v772_v31 = vpop.permute.xlu0 %771  ;;  %1319 = vset.pattern.permute.xlu1 %v1587_v26  ;;  %v697_v26 = vmul.f32 %v696_v44, %v1841_v37  ;;  %v755_v1 = vperm.slane %v1836_v34, 3 }
 0x3ff   :  { %v778_v32 = vsel %vm427_vm15, %v764_v41, %v772_v31  ;;  %966 = vperm.xlu1 %1319, %v1769_v8   ;;  %v1089_v41 = vadd.f32 1.0, %v1396_v45 }
 0x400   :  { %v1893_v40 = vmul.f32 %v800_v30, %v778_v32  ;;  %1342 = vset.pattern.permute.xlu2 %v1588_v39  ;;  %v699_v47 = vmul.f32 1.442695, %v697_v26  ;;  %v756_v6 = vmul.f32 %v755_v1, %v1841_v37  ;;  %v815_v32 = vmul.f32 %v814_v19, %v1841_v37 }
 0x401   :  { %1011 = vperm.xlu2 %1342, %v1798_v17   ;;  %v782_v43 = vpop.permute.xlu2 %781  ;;  %1397 = vrcp.f32 %v1089_v41  ;;  %v1102_v25 = vand.u32 2147483648, %v1089_v41  ;;  %vm1096_vm5 = vweird.f32 %v1089_v41  ;;  %v1100_v27 = vand.u32 2147483647, %v1089_v41 }
 0x402   :  { %1399 = vpow2.f32 %v699_v47  ;;  %v758_v31 = vmul.f32 1.442695, %v756_v6  ;;  %v817_v26 = vmul.f32 1.442695, %v815_v32  ;;  %v741_v47 = vperm.slane %v1866_v52, 2 }
 0x403   :  { %v1103_v45 = vor.u32 1.1754944e-38, %v1102_v25  ;;  %vm1101_vm7 = vcmp.eq.f32.partialorder %v1100_v27, 8.507059e+37  ;;  %v859_v27 = vperm.slane %v1866_v52, 4 }
 0x404   :  { %1401 = vpow2.f32 %v758_v31 }
 0x405   :  { %v646_v46 = vpop.permute.xlu1 %645  ;;  %1403 = vpow2.f32 %v817_v26 }
 0x407   :  { %1320 = vset.pattern.permute.xlu1 %v1573_v60  ;;  %v1398_v55 = vpop.eup %1397 }
 0x408   :  { %588 = vperm.xlu1 %1320, %v1798_v17   ;;  %v1400_v59 = vpop.eup %1399  ;;  %v1092_v62 = vmul.f32 %v1398_v55, %v1089_v41  ;;  %vm1097_vm4 = vweird.f32 %v1398_v55 }
 0x409   :  { %1346 = vset.pattern.permute.xlu2 %v1584_v16  ;;  %vm1098_vm6 = vmor %vm1096_vm5, %vm1097_vm4  ;;  %vm1055_vm4 = vcmask 1043456  }
 0x40a   :  { %911 = vperm.xlu2 %1346, %v1814_v21   ;;  %v790_v48 = vpop.permute.xlu2 %789  ;;  %v1093_v0 = vsub.f32 1.0, %v1092_v62 }
 0x40b   :  { %v1906_v49 = vsel %vm427_vm15, %v782_v43, %v790_v48 }
 0x40c   :  { %v1094_v2 = vmul.f32 %v1398_v55, %v1093_v0 }
 0x40e   :  { %v654_v51 = vpop.permute.xlu1 %653 }
 0x40f   :  { %v660_v53 = vsel %vm427_vm15, %v646_v46, %v654_v51 }
 0x410   :  { %v683_v60 = vmul.f32 %v682_v50, %v660_v53  ;;  %608 = vperm.xlu1 %1320, %v1814_v21  }
 0x412   :  { %1347 = vset.pattern.permute.xlu2 %v1580_v12  ;;  %v685_v58 = vadd.f32 %v683_v60, %v680_v20  ;;  %v1402_v60 = vpop.eup %1401 }
 0x413   :  { %962 = vperm.xlu2 %1347, %v1814_v21   ;;  %v1404_v62 = vpop.eup %1403  ;;  %v849_v6 = vpop.permute.xlu2 %848 }
 0x414   :  { %v739_v61 = vmul.f32 %v1400_v59, %v685_v58 }
 0x417   :  { %v664_v63 = vpop.permute.xlu1 %663 }
 0x418   :  { %1322 = vset.pattern.permute.xlu1 %v1575_v4  ;;  %v1095_v4 = vadd.f32 %v1398_v55, %v1094_v2  ;;  %v932_v2 = vperm.slane %v1836_v34, 6 }
 0x419   :  { %616 = vperm.xlu1 %1322, %v1814_v21  }
 0x41a   :  { %v1099_v43 = vsel %vm1098_vm6, %v1398_v55, %v1095_v4  ;;  %v873_v55 = vperm.slane %v1836_v34, 5 }
 0x41b   :  { %1349 = vset.pattern.permute.xlu2 %v1583_v15  ;;  %v1104_v46 = vsel %vm1101_vm7, %v1103_v45, %v1099_v43 }
 0x41c   :  { %1017 = vperm.xlu2 %1349, %v1769_v8   ;;  %v874_v0 = vmul.f32 %v873_v55, %v1841_v37  ;;  %v900_v26 = vpop.permute.xlu2 %899 }
 0x420   :  { %v672_v12 = vpop.permute.xlu1 %671 }
 0x421   :  { %v678_v20 = vsel %vm427_vm15, %v664_v63, %v672_v12  ;;  %1323 = vset.pattern.permute.xlu1 %v1579_v11  ;;  %v876_v12 = vmul.f32 1.442695, %v874_v0 }
 0x422   :  { %v1926_v24 = vmul.f32 %v685_v58, %v678_v20  ;;  %649 = vperm.xlu1 %1323, %v1798_v17   ;;  %v941_v58 = vpop.permute.xlu0 %940  ;;  %v991_v20 = vperm.slane %v1836_v34, 7 }
 0x423   :  { %1405 = vpow2.f32 %v876_v12 }
 0x424   :  { %1350 = vset.pattern.permute.xlu2 %v1588_v39 }
 0x425   :  { %1025 = vperm.xlu2 %1350, %v1769_v8   ;;  %v1121_v8 = vmul.f32 %v1104_v46, %v1687_v54 }
 0x429   :  { %v705_v48 = vpop.permute.xlu1 %704  ;;  %v1406_v46 = vpop.eup %1405 }
 0x42a   :  { %v719_v41 = vsel %vm427_vm15, %v705_v48, %v1826_v29  ;;  %1324 = vset.pattern.permute.xlu1 %v1582_v14  ;;  %v1000_v4 = vpop.permute.xlu0 %999 }
 0x42b   :  { %v742_v51 = vmul.f32 %v741_v47, %v719_v41  ;;  %657 = vperm.xlu1 %1324, %v1798_v17  }
 0x42d   :  { %1125 = vrot.lane.b32.xlu2 %v1121_v8, %s1564_s25  ;;  %v744_v53 = vadd.f32 %v742_v51, %v739_v61 }
 0x42f   :  { %v798_v59 = vmul.f32 %v1402_v60, %v744_v53 }
 0x431   :  { %v803_v29 = vadd.f32 %v1893_v40, %v798_v59  ;;  %v933_v40 = vmul.f32 %v932_v2, %v1841_v37 }
 0x432   :  { %v823_v63 = vpop.permute.xlu1 %822  ;;  %v908_v41 = vpop.permute.xlu0 %907 }
 0x433   :  { %1325 = vset.pattern.permute.xlu1 %v1579_v11  ;;  %v857_v54 = vmul.f32 %v1404_v62, %v803_v29  ;;  %v1951_v61 = vmul.f32 %v803_v29, %v1906_v49  ;;  %v935_v25 = vmul.f32 1.442695, %v933_v40  ;;  %v992_v49 = vmul.f32 %v991_v20, %v1841_v37 }
 0x434   :  { %667 = vperm.xlu1 %1325, %v1814_v21   ;;  %v914_v8 = vsel %vm427_vm15, %v900_v26, %v908_v41 }
 0x435   :  { %1407 = vpow2.f32 %v935_v25  ;;  %v994_v45 = vmul.f32 1.442695, %v992_v49  ;;  %v1036_v25 = vperm.slane %v1866_v52, 7 }
 0x437   :  { %1409 = vpow2.f32 %v994_v45 }
 0x43b   :  { %v831_v11 = vpop.permute.xlu1 %830  ;;  %v1408_v37 = vpop.eup %1407 }
 0x43c   :  { %v837_v31 = vsel %vm427_vm15, %v823_v63, %v831_v11  ;;  %1326 = vset.pattern.permute.xlu1 %v1582_v14  ;;  %v977_v14 = vperm.slane %v1866_v52, 6 }
 0x43d   :  { %v860_v32 = vmul.f32 %v859_v27, %v837_v31  ;;  %675 = vperm.xlu1 %1326, %v1814_v21   ;;  %v1410_v0 = vpop.eup %1409  ;;  %v489_v31 = vld [vmem:[#allocation8 + $0x8] sm:$0xff] }
 0x43f   :  { %v862_v43 = vadd.f32 %v860_v32, %v857_v54 }
 0x441   :  { %v916_v48 = vmul.f32 %v1406_v46, %v862_v43 }
 0x443   :  { %v921_v51 = vadd.f32 %v1882_v22, %v916_v48 }
 0x444   :  { %v949_v60 = vpop.permute.xlu1 %948 }
 0x445   :  { %v955_v59 = vsel %vm427_vm15, %v941_v58, %v949_v60  ;;  %1327 = vset.pattern.permute.xlu1 %v1576_v7  ;;  %v975_v29 = vmul.f32 %v1408_v37, %v921_v51  ;;  %v1972_v62 = vmul.f32 %v921_v51, %v914_v8 }
 0x446   :  { %v978_v63 = vmul.f32 %v977_v14, %v955_v59  ;;  %708 = vperm.xlu1 %1327, %v1798_v17   ;;  %v597_v59 = vpop.permute.xlu2 %596 }
 0x448   :  { %v980_v22 = vadd.f32 %v978_v63, %v975_v29  ;;  %v1084_v29 = vsub.f32 0.0, %v1690_v57 }
 0x44a   :  { %v1034_v54 = vmul.f32 %v1410_v0, %v980_v22  ;;  %v1087_v0 = vmul.f32 1.442695, %v1084_v29 }
 0x44d   :  { %v731_v12 = vpop.permute.xlu1 %730 }
 0x44e   :  { %v737_v40 = vsel %vm427_vm15, %v1839_v35, %v731_v12  ;;  %1328 = vset.pattern.permute.xlu1 %v1574_v3  ;;  %v492_v3 = vmul.f32 1.442695, %v489_v31 }
 0x44f   :  { %v1980_v58 = vmul.f32 %v744_v53, %v737_v40  ;;  %716 = vperm.xlu1 %1328, %v1798_v17  }
 0x450   :  { %1411 = vpow2.f32 %v492_v3 }
 0x456   :  { %v1008_v11 = vpop.permute.xlu1 %1007 }
 0x457   :  { %v1014_v49 = vsel %vm427_vm15, %v1000_v4, %v1008_v11  ;;  %1329 = vset.pattern.permute.xlu1 %v1576_v7  ;;  %v1412_v7 = vpop.eup %1411 }
 0x458   :  { %v1037_v32 = vmul.f32 %v1036_v25, %v1014_v49  ;;  %726 = vperm.xlu1 %1329, %v1814_v21   ;;  %v1996_v4 = vsub.f32 0.0, %v1412_v7 }
 0x45a   :  { %v1989_v35 = vadd.f32 %v1037_v32, %v1034_v54  ;;  %v576_v48 = vmul.f32 %v574_v38, %v1996_v4 }
 0x45c   :  { %v579_v41 = vmul.f32 1.442695, %v576_v48 }
 0x45e   :  { %1413 = vpow2.f32 %v579_v41 }
 0x45f   :  { %v841_v53 = vpop.permute.xlu1 %840 }
 0x460   :  { %v855_v45 = vsel %vm427_vm15, %v841_v53, %v849_v6  ;;  %1330 = vset.pattern.permute.xlu1 %v1578_v10 }
 0x461   :  { %v1993_v46 = vmul.f32 %v862_v43, %v855_v45  ;;  %767 = vperm.xlu1 %1330, %v1798_v17   ;;  %v639_v43 = vmul.f32 %v637_v42, %v1996_v4 }
 0x463   :  { %v642_v8 = vmul.f32 1.442695, %v639_v43 }
 0x464   :  { %v1414_v60 = vpop.eup %1413 }
 0x465   :  { %1415 = vpow2.f32 %v642_v8 }
 0x466   :  { %1417 = vpow2.f32 %v1087_v0 }
 0x468   :  { %v959_v26 = vpop.permute.xlu1 %958 }
 0x469   :  { %1334 = vset.pattern.permute.xlu1 %v1581_v13 }
 0x46a   :  { %885 = vperm.xlu1 %1334, %v1798_v17  }
 0x471   :  { %v967_v6 = vpop.permute.xlu1 %966 }
 0x472   :  { %v973_v51 = vsel %vm427_vm15, %v959_v26, %v967_v6  ;;  %1335 = vset.pattern.permute.xlu1 %v1584_v16  ;;  %v622_v16 = vmul.f32 0.0, %v1414_v60 }
 0x473   :  { %v2008_v37 = vmul.f32 %v980_v22, %v973_v51  ;;  %893 = vperm.xlu1 %1335, %v1798_v17   ;;  %v1416_v17 = vpop.eup %1415 }
 0x474   :  { %v1418_v40 = vpop.eup %1417 }
 0x475   :  { %v1090_v49 = vadd.f32 1.0, %v1418_v40 }
 0x477   :  { %1419 = vrcp.f32 %v1090_v49  ;;  %v1117_v51 = vand.u32 2147483648, %v1090_v49  ;;  %vm1111_vm12 = vweird.f32 %v1090_v49  ;;  %v1115_v8 = vand.u32 2147483647, %v1090_v49 }
 0x479   :  { %v1118_v60 = vor.u32 1.1754944e-38, %v1117_v51  ;;  %vm1116_vm14 = vcmp.eq.f32.partialorder %v1115_v8, 8.507059e+37 }
 0x47a   :  { %v589_v38 = vpop.permute.xlu1 %588 }
 0x47b   :  { %v600_v63 = vsel %vm427_vm15, %v589_v38, %v597_v59  ;;  %1339 = vset.pattern.permute.xlu1 %v1578_v10 }
 0x47c   :  { %v625_v42 = vmul.f32 %v623_v56, %v600_v63  ;;  %785 = vperm.xlu1 %1339, %v1814_v21  }
 0x47d   :  { %v1420_v3 = vpop.eup %1419 }
 0x47e   :  { %v627_v22 = vadd.f32 %v625_v42, %v622_v16  ;;  %v1107_v45 = vmul.f32 %v1420_v3, %v1090_v49  ;;  %vm1112_vm11 = vweird.f32 %v1420_v3 }
 0x47f   :  { %vm1113_vm13 = vmor %vm1111_vm12, %vm1112_vm11 }
 0x480   :  { %v681_v54 = vmul.f32 %v1416_v17, %v627_v22 }
 0x482   :  { %v609_v12 = vpop.permute.xlu1 %608 }
 0x484   :  { %1340 = vset.pattern.permute.xlu1 %v1577_v9  ;;  %v698_v9 = vmul.f32 %v696_v44, %v1996_v4 }
 0x485   :  { %793 = vperm.xlu1 %1340, %v1814_v21  }
 0x486   :  { %v701_v53 = vmul.f32 1.442695, %v698_v9 }
 0x488   :  { %1421 = vpow2.f32 %v701_v53 }
 0x48b   :  { %v617_v11 = vpop.permute.xlu1 %616 }
 0x48c   :  { %v620_v10 = vsel %vm427_vm15, %v609_v12, %v617_v11  ;;  %v757_v11 = vmul.f32 %v755_v1, %v1996_v4 }
 0x48d   :  { %v629_v31 = vmul.f32 %v627_v22, %v620_v10  ;;  %1344 = vset.pattern.permute.xlu1 %v1585_v18  ;;  %v1108_v18 = vsub.f32 1.0, %v1107_v45  ;;  %v835_v45 = vpop.permute.xlu0 %834 }
 0x48e   :  { %852 = vperm.xlu1 %1344, %v1814_v21   ;;  %v1422_v41 = vpop.eup %1421 }
 0x48f   :  { %v630_v56 = vadd.f32 %v629_v31, %v1885_v28  ;;  %v1109_v48 = vmul.f32 %v1420_v3, %v1108_v18  ;;  %v760_v31 = vmul.f32 1.442695, %v757_v11 }
 0x491   :  { %v1110_v6 = vadd.f32 %v1420_v3, %v1109_v48  ;;  %v631_v59 = vrot.slane %v630_v56, 4  ;;  %1423 = vpow2.f32 %v760_v31 }
 0x493   :  { %v632_v29 = vadd.f32 %v631_v59, %v630_v56 }
 0x494   :  { %v650_v32 = vpop.permute.xlu1 %649 }
 0x495   :  { %v633_v17 = vrot.slane %v632_v29, 2  ;;  %v735_v48 = vpop.permute.xlu0 %734 }
 0x496   :  { %1345 = vset.pattern.permute.xlu1 %v1581_v13 }
 0x497   :  { %903 = vperm.xlu1 %1345, %v1814_v21   ;;  %v1424_v1 = vpop.eup %1423 }
 0x49d   :  { %v658_v7 = vpop.permute.xlu1 %657  ;;  %v845_v31 = vpop.permute.xlu0 %844 }
 0x49e   :  { %v661_v26 = vsel %vm427_vm15, %v650_v32, %v658_v7 }
 0x49f   :  { %v684_v28 = vmul.f32 %v682_v50, %v661_v26  ;;  %1351 = vset.pattern.permute.xlu1 %v1583_v15  ;;  %v1114_v50 = vsel %vm1113_vm13, %v1420_v3, %v1110_v6  ;;  %v776_v15 = vpop.permute.xlu2 %775  ;;  %v816_v6 = vmul.f32 %v814_v19, %v1996_v4 }
 0x4a0   :  { %1021 = vperm.xlu1 %1351, %v1814_v21   ;;  %v1119_v38 = vsel %vm1116_vm14, %v1118_v60, %v1114_v50 }
 0x4a1   :  { %v686_v44 = vadd.f32 %v684_v28, %v681_v54  ;;  %v1122_v42 = vmul.f32 %v1119_v38, %v1690_v57  ;;  %v634_v54 = vadd.f32 %v633_v17, %v632_v29  ;;  %v819_v50 = vmul.f32 1.442695, %v816_v6 }
 0x4a3   :  { %v740_v13 = vmul.f32 %v1422_v41, %v686_v44  ;;  %v635_v10 = vrot.slane %v634_v54, 1  ;;  %1425 = vpow2.f32 %v819_v50 }
 0x4a5   :  { %v636_v9 = vadd.f32 %v635_v10, %v634_v54  ;;  %v971_v34 = vpop.permute.xlu0 %970 }
 0x4a6   :  { %v668_v43 = vpop.permute.xlu1 %667 }
 0x4a7   :  { %v827_v0 = vpop.permute.xlu2 %826 }
 0x4a8   :  { %1352 = vset.pattern.permute.xlu1 %v1588_v39 }
 0x4a9   :  { %1029 = vperm.xlu1 %1352, %v1814_v21   ;;  %v1426_v17 = vpop.eup %1425 }
 0x4af   :  { %v676_v63 = vpop.permute.xlu1 %675  ;;  %v945_v56 = vpop.permute.xlu2 %944 }
 0x4b0   :  { %v679_v16 = vsel %vm427_vm15, %v668_v43, %v676_v63 }
 0x4b1   :  { %v688_v22 = vmul.f32 %v686_v44, %v679_v16  ;;  %1127 = vrot.lane.b32.xlu1 %v1122_v42, %s1564_s25  ;;  %v838_v16 = vsel %vm427_vm15, %v827_v0, %v835_v45 }
 0x4b3   :  { %v689_v39 = vadd.f32 %v688_v22, %v1926_v24 }
 0x4b5   :  { %v690_v21 = vrot.slane %v689_v39, 4 }
 0x4b7   :  { %v691_v12 = vadd.f32 %v690_v21, %v689_v39  ;;  %v953_v28 = vpop.permute.xlu2 %952 }
 0x4b8   :  { %v709_v40 = vpop.permute.xlu1 %708  ;;  %v956_v45 = vsel %vm427_vm15, %v945_v56, %v953_v28 }
 0x4b9   :  { %v692_v49 = vrot.slane %v691_v12, 2 }
 0x4bb   :  { %v693_v57 = vadd.f32 %v692_v49, %v691_v12 }
 0x4bd   :  { %v694_v32 = vrot.slane %v693_v57, 1 }
 0x4bf   :  { %v695_v3 = vadd.f32 %v694_v32, %v693_v57  ;;  %v993_v57 = vmul.f32 %v991_v20, %v1996_v4 }
 0x4c1   :  { %v717_v24 = vpop.permute.xlu1 %716  ;;  %v1051_v53 = vsel %vm1050_vm1, %v636_v9, %v695_v3  ;;  %v996_v32 = vmul.f32 1.442695, %v993_v57  ;;  %v1260_v57 = vld [vmem:[%s2135_s10 + $0x10] sm:$0xff] }
 0x4c2   :  { %v720_v7 = vsel %vm427_vm15, %v709_v40, %v717_v24 }
 0x4c3   :  { %v743_v18 = vmul.f32 %v741_v47, %v720_v7  ;;  %v875_v47 = vmul.f32 %v873_v55, %v1996_v4  ;;  %v861_v55 = vmul.f32 %v859_v27, %v838_v16  ;;  %v979_v7 = vmul.f32 %v977_v14, %v956_v45 }
 0x4c5   :  { %v745_v26 = vadd.f32 %v743_v18, %v740_v13  ;;  %v1004_v13 = vpop.permute.xlu2 %1003  ;;  %v878_v38 = vmul.f32 1.442695, %v875_v47 }
 0x4c7   :  { %v799_v44 = vmul.f32 %v1424_v1, %v745_v26  ;;  %1427 = vpow2.f32 %v878_v38 }
 0x4ca   :  { %v727_v41 = vpop.permute.xlu1 %726 }
 0x4cb   :  { %v738_v43 = vsel %vm427_vm15, %v727_v41, %v735_v48 }
 0x4cc   :  { %v747_v51 = vmul.f32 %v745_v26, %v738_v43 }
 0x4cd   :  { %v1012_v21 = vpop.permute.xlu2 %1011  ;;  %v1428_v11 = vpop.eup %1427 }
 0x4ce   :  { %v748_v8 = vadd.f32 %v747_v51, %v1980_v58  ;;  %v1015_v18 = vsel %vm427_vm15, %v1004_v13, %v1012_v21 }
 0x4d0   :  { %v749_v60 = vrot.slane %v748_v8, 4 }
 0x4d2   :  { %v750_v59 = vadd.f32 %v749_v60, %v748_v8 }
 0x4d3   :  { %v768_v29 = vpop.permute.xlu1 %767 }
 0x4d4   :  { %v751_v63 = vrot.slane %v750_v59, 2  ;;  %v779_v42 = vsel %vm427_vm15, %v768_v29, %v776_v15 }
 0x4d5   :  { %v802_v19 = vmul.f32 %v800_v30, %v779_v42  ;;  %v934_v30 = vmul.f32 %v932_v2, %v1996_v4  ;;  %v912_v27 = vpop.permute.xlu2 %911 }
 0x4d6   :  { %v752_v58 = vadd.f32 %v751_v63, %v750_v59 }
 0x4d7   :  { %v804_v22 = vadd.f32 %v802_v19, %v799_v44  ;;  %v937_v10 = vmul.f32 1.442695, %v934_v30 }
 0x4d8   :  { %v753_v39 = vrot.slane %v752_v58, 1 }
 0x4d9   :  { %v858_v54 = vmul.f32 %v1426_v17, %v804_v22  ;;  %1429 = vpow2.f32 %v937_v10 }
 0x4da   :  { %v754_v12 = vadd.f32 %v753_v39, %v752_v58  ;;  %1431 = vpow2.f32 %v996_v32  ;;  %v1259_v32 = vld [vmem:[%s2135_s10 + $0x8] sm:$0xff] }
 0x4db   :  { %v863_v40 = vadd.f32 %v861_v55, %v858_v54 }
 0x4dc   :  { %v886_v15 = vpop.permute.xlu1 %885  ;;  %v1053_v0 = vsel %vm1052_vm2, %v1051_v53, %v754_v12 }
 0x4dd   :  { %v917_v49 = vmul.f32 %v1428_v11, %v863_v40  ;;  %v963_v20 = vpop.permute.xlu2 %962 }
 0x4de   :  { %v974_v44 = vsel %vm427_vm15, %v963_v20, %v971_v34 }
 0x4df   :  { %v1430_v53 = vpop.eup %1429 }
 0x4e0   :  { %v1432_v1 = vpop.eup %1431 }
 0x4e5   :  { %v894_v9 = vpop.permute.xlu1 %893  ;;  %v1018_v21 = vpop.permute.xlu2 %1017 }
 0x4e6   :  { %v897_v3 = vsel %vm427_vm15, %v886_v15, %v894_v9  ;;  %v1261_v15 = vld [vmem:[%s2135_s10 + $0x18] sm:$0xff] }
 0x4e7   :  { %v920_v24 = vmul.f32 %v918_v5, %v897_v3  ;;  %v1038_v5 = vmul.f32 %v1036_v25, %v1015_v18  ;;  %1173 = vmatpush.bf16.msra.mxu2 %v1261_v15 }
 0x4e9   :  { %v922_v2 = vadd.f32 %v920_v24, %v917_v49 }
 0x4eb   :  { %v976_v4 = vmul.f32 %v1430_v53, %v922_v2  ;;  %1174 = vmatpush.bf16.msra.mxu2 %v1260_v57 }
 0x4ed   :  { %v981_v26 = vadd.f32 %v979_v7, %v976_v4  ;;  %v1026_v9 = vpop.permute.xlu2 %1025 }
 0x4ee   :  { %v786_v48 = vpop.permute.xlu1 %785  ;;  %v1032_v45 = vsel %vm427_vm15, %v1018_v21, %v1026_v9 }
 0x4ef   :  { %v983_v56 = vmul.f32 %v981_v26, %v974_v44  ;;  %v1035_v28 = vmul.f32 %v1432_v1, %v981_v26  ;;  %1175 = vmatpush.bf16.msra.mxu2 %v1259_v32  ;;  %v1041_v4 = vmul.f32 %v1989_v35, %v1032_v45  ;;  %v1362_v35 = vld [vmem:[%s2134_s9] ss:$0 sm:$0xff] }
 0x4f1   :  { %v984_v41 = vadd.f32 %v983_v56, %v2008_v37  ;;  %v1040_v6 = vadd.f32 %v1038_v5, %v1035_v28 }
 0x4f3   :  { %v985_v37 = vrot.slane %v984_v41, 4 }
 0x4f5   :  { %v986_v17 = vadd.f32 %v985_v37, %v984_v41 }
 0x4f7   :  { %v794_v43 = vpop.permute.xlu1 %793 }
 0x4f8   :  { %v797_v14 = vsel %vm427_vm15, %v786_v48, %v794_v43  ;;  %v1258_v43 = vld [vmem:[%s2135_s10] sm:$0xff] }
 0x4f9   :  { %v806_v51 = vmul.f32 %v804_v22, %v797_v14  ;;  %1176 = vmatpush.bf16.msra.mxu2 %v1258_v43  ;;  %v1069_v14 = vmul.f32 %v1362_v35, %v1738_v36 }
 0x4fb   :  { %v807_v8 = vadd.f32 %v806_v51, %v1951_v61  ;;  %v1070_v51 = vmul.f32 %v1362_v35, %v1728_v23  ;;  %v1433_v23 = vld [vmem:[%s2125_s0] sm:$0xff] }
 0x4fd   :  { %v808_v50 = vrot.slane %v807_v8, 4 }
 0x4ff   :  { %v809_v47 = vadd.f32 %v808_v50, %v807_v8  ;;  %v1075_v50 = vrot.slane %v1069_v14, 3 }
 0x500   :  { %v853_v13 = vpop.permute.xlu1 %852 }
 0x501   :  { %v810_v60 = vrot.slane %v809_v47, 2  ;;  %v856_v59 = vsel %vm427_vm15, %v845_v31, %v853_v13 }
 0x502   :  { %v865_v38 = vmul.f32 %v863_v40, %v856_v59  ;;  %v987_v40 = vrot.slane %v986_v17, 2 }
 0x503   :  { %v811_v52 = vadd.f32 %v810_v60, %v809_v47  ;;  %v1077_v47 = vrot.slane %v1070_v51, 3 }
 0x504   :  { %v866_v25 = vadd.f32 %v865_v38, %v1993_v46  ;;  %v988_v49 = vadd.f32 %v987_v40, %v986_v17 }
 0x505   :  { %v812_v29 = vrot.slane %v811_v52, 1  ;;  %v1078_v59 = vsel %vm482_vm3, %v1075_v50, %v1077_v47 }
 0x506   :  { %v867_v63 = vrot.slane %v866_v25, 4 }
 0x507   :  { %v813_v42 = vadd.f32 %v812_v29, %v811_v52 }
 0x508   :  { %v868_v19 = vadd.f32 %v867_v63, %v866_v25  ;;  %v1126_v25 = vpop.permute.xlu2 %1125 }
 0x509   :  { %v904_v16 = vpop.permute.xlu1 %903  ;;  %v1054_v58 = vsel %vm209_vm8, %v1053_v0, %v813_v42 }
 0x50a   :  { %v869_v22 = vrot.slane %v868_v19, 2  ;;  %v915_v61 = vsel %vm427_vm15, %v904_v16, %v912_v27  ;;  %v989_v27 = vrot.slane %v988_v49, 1  ;;  %v1434_v16 = vld [vmem:[%s2125_s0 + $0x8] sm:$0xff] }
 0x50b   :  { %v924_v39 = vmul.f32 %v922_v2, %v915_v61 }
 0x50c   :  { %v870_v55 = vadd.f32 %v869_v22, %v868_v19  ;;  %v990_v2 = vadd.f32 %v989_v27, %v988_v49 }
 0x50d   :  { %v925_v54 = vadd.f32 %v924_v39, %v1972_v62 }
 0x50e   :  { %v871_v12 = vrot.slane %v870_v55, 1 }
 0x50f   :  { %v926_v46 = vrot.slane %v925_v54, 4 }
 0x510   :  { %v872_v11 = vadd.f32 %v871_v12, %v870_v55 }
 0x511   :  { %v927_v30 = vadd.f32 %v926_v46, %v925_v54 }
 0x512   :  { %v1022_v0 = vpop.permute.xlu1 %1021  ;;  %v1056_v10 = vsel %vm1055_vm4, %v1054_v58, %v872_v11 }
 0x513   :  { %v928_v31 = vrot.slane %v927_v30, 2 }
 0x515   :  { %v929_v62 = vadd.f32 %v928_v31, %v927_v30 }
 0x517   :  { %v930_v3 = vrot.slane %v929_v62, 1 }
 0x519   :  { %v931_v24 = vadd.f32 %v930_v3, %v929_v62 }
 0x51b   :  { %v1030_v53 = vpop.permute.xlu1 %1029  ;;  %v1057_v7 = vsel %vm482_vm3, %v1056_v10, %v931_v24 }
 0x51c   :  { %v1033_v34 = vsel %vm427_vm15, %v1022_v0, %v1030_v53  ;;  %v1058_v20 = vsel %vm236_vm9, %v1057_v7, %v990_v2 }
 0x51d   :  { %v1042_v18 = vmul.f32 %v1040_v6, %v1033_v34  ;;  %v1068_v6 = vmul.f32 %v1362_v35, %v1735_v33 }
 0x51f   :  { %v1043_v26 = vadd.f32 %v1042_v18, %v1041_v4  ;;  %v1074_v8 = vrot.slane %v1068_v6, 3 }
 0x521   :  { %v1044_v1 = vrot.slane %v1043_v26, 4  ;;  %v1076_v13 = vsel %vm482_vm3, %v1074_v8, %v1075_v50 }
 0x523   :  { %v1045_v44 = vadd.f32 %v1044_v1, %v1043_v26  ;;  %v1128_v29 = vpop.permute.xlu1 %1127 }
 0x525   :  { %v1046_v48 = vrot.slane %v1045_v44, 2 }
 0x527   :  { %v1047_v5 = vadd.f32 %v1046_v48, %v1045_v44 }
 0x529   :  { %v1048_v56 = vrot.slane %v1047_v5, 1 }
 0x52b   :  { %v1049_v28 = vadd.f32 %v1048_v56, %v1047_v5 }
 0x52d   :  { %v1059_v41 = vsel %vm267_vm10, %v1058_v20, %v1049_v28 }
 0x52e   :  { %1061 = vrot.lane.b32.xlu0 %v1059_v41, %s1564_s25  ;;  %v1081_v60 = vadd.f32 %v1076_v13, %v1059_v41  ;;  %s1589_s25 = smov [#allocation10]  }
 0x52f   :  { %s1191_s29 = sshll.u32 %s1589_s25, 4  ;;  %s1192_s29 = int_to_ptr.vmem [resolvable:$true] %s1191_s29 }
 0x530   :  { %v1131_v63 = vmul.f32 %v1126_v25, %v1081_v60 }
 0x5a0   :  { %v1062_v38 = vpop.permute.xlu0 %1061 }
 0x5a1   :  { %v1082_v52 = vadd.f32 %v1078_v59, %v1062_v38 }
 0x5a3   :  { %v1132_v37 = vmul.f32 %v1128_v29, %v1082_v52 }
 0x5a5   :  { %v1133_v42 = vpack.c.bf16 %v1132_v37, %v1131_v63 }
 0x5a7   :  { %1251 = vmatmul.msk.bf16.vlgmr.msra.gmra.mxu2 %vm427_vm15, %v1133_v42 }
 0x62a   :  { %v1178_v33 = vpop.f32.mrf.mxu2 }
 0x62b   :  { %v1183_v36 = vadd.f32 %v1433_v23, %v1178_v33 }
 0x62d   :  { %1185 = vst.msk [vmem:[#allocation10] sm:$0xff] %vm101_vm0, %v1183_v36 }
 0x632   :  { %v1180_v19 = vpop.f32.mrf.mxu2 }
 0x633   :  { %v1184_v58 = vadd.f32 %v1434_v16, %v1180_v19 }
 0x635   :  { %1186 = vst.msk [vmem:[#allocation10 + $0x8] sm:$0xff] %vm101_vm0, %v1184_v58 }
 0x636   :  { %1199 = dma.vmem_to_hbm [thread:$0]  %s1192_s29, 256, %s1194_s12, [#allocation4], %s1569_s18, %s1569_s18, %s1570_s19  }
 0x637   :  { %1561 = dma.done.wait [#allocation4], 256  }
 0x638   :  { %1562 = vsyncadd [#allocation4], 4294967040 }
 0x639   :  { %1204 = vsyncpa [#allocation3], 1 }
 0x63a   :  { %1205 = vsyncpa [#allocation6], 1 }
 0x63b   :  { %1206 = vsyncpa [#allocation9], 1 }
 0x63c   :  { %1207 = vsyncpa [#allocation4], 1 }

</bundles_post_ra>
